<compile_context>
chip_gen: v6e
topology: v6e:2x2x1
jax: 0.10.0
libtpu: 0.0.40
codegen_flags: <defaults>
</compile_context>

<pallas_src>
import math

import jax
import jax.numpy as jnp
from jax.experimental import pallas as pl
from jax.experimental.pallas import tpu as pltpu

# ---- small synthetic "bert config" (stands in for BertModel.from_pretrained) ----
VOCAB = 100
MAX_POS = 32
TYPE_VOCAB = 2
HIDDEN = 32
NUM_HEADS = 4
HEAD_DIM = HIDDEN // NUM_HEADS
INTERMEDIATE = 64
NUM_LAYERS = 2
NUM_CLASSES = 3
LN_EPS = 1e-12

# padded (lane-dense) dims
HP = 128                       # padded hidden
IP = 128                       # padded intermediate
NCP = 128                      # padded num_classes
HB = 128                       # per-head lane block
QKVW = 3 * NUM_HEADS * HB      # fused, head-aligned QKV width (1536)
OWR = NUM_HEADS * HB           # expanded o_w row count (512)


# --------------------------- in-kernel helpers ---------------------------

def _layernorm_padded(y, g, b):
    """LayerNorm over the first HIDDEN lanes of a (rows, HP) slab (f32 math).

    Relies on the invariant that lanes [HIDDEN:HP] of `y` are exactly zero, so the
    sum over all lanes equals the sum over real lanes.  g/b are zero on padded lanes,
    which keeps padded output lanes exactly zero.
    """
    inv_h = 1.0 / HIDDEN
    mean = jnp.sum(y, axis=-1, keepdims=True) * inv_h
    ex2 = jnp.sum(y * y, axis=-1, keepdims=True) * inv_h
    var = jnp.maximum(ex2 - mean * mean, 0.0)
    return (y - mean) * jax.lax.rsqrt(var + LN_EPS) * g + b


def _gelu(y):
    # TODO(synk): HF BERT uses exact erf-GELU; tanh approximation used here.
    c = math.sqrt(2.0 / math.pi)
    return 0.5 * y * (1.0 + jnp.tanh(c * (y + 0.044715 * y * y * y)))


# --------------------------- fused Pallas kernel ---------------------------

def _bert_fused_kernel(x_emb_ref, bias_ref, emb_vec_ref,
                       qkv_w_ref, qkv_b_ref, o_w_ref, i_w_ref, f_w_ref, vec_ref,
                       pooler_w_ref, fc_w_ref, head_vec_ref,
                       out_ref, x_scr):
    """One grid step == one BERT encoder layer; embed-LN on first step, head on last."""
    l = pl.program_id(0)

    # ---- first step: embedding LayerNorm into the persistent activation scratch ----
    @pl.when(l == 0)
    def _():
        emb = x_emb_ref[...]                                   # (R, HP) f32, padded lanes 0
        x_scr[...] = _layernorm_padded(
            emb, emb_vec_ref[0:1, :], emb_vec_ref[1:2, :]).astype(jnp.bfloat16)

    x_bf = x_scr[...]                                          # (R, HP) bf16 residual stream
    x_f32 = x_bf.astype(jnp.float32)

    vec = vec_ref[0]                                           # (8, HP) f32 bias/LN slab
    o_b, ln1_g, ln1_b = vec[0:1, :], vec[1:2, :], vec[2:3, :]
    i_b, f_b = vec[3:4, :], vec[4:5, :]
    ln2_g, ln2_b = vec[5:6, :], vec[6:7, :]

    # ---- fused QKV projection (head-aligned 128-lane blocks, scale folded into Q) ----
    qkv = jnp.dot(x_bf, qkv_w_ref[0],
                  preferred_element_type=jnp.float32) + qkv_b_ref[0]      # (R, QKVW)

    bias = bias_ref[...]                                       # (R, R) additive mask bias

    ctx_heads = []
    for h in range(NUM_HEADS):
        base = h * 3 * HB
        q_h = qkv[:, base:base + HB].astype(jnp.bfloat16)      # (R, 128) full tile
        k_h = qkv[:, base + HB:base + 2 * HB].astype(jnp.bfloat16)
        v_h = qkv[:, base + 2 * HB:base + 3 * HB].astype(jnp.bfloat16)
        s = jax.lax.dot_general(q_h, k_h, (((1,), (1,)), ((), ())),
                                preferred_element_type=jnp.float32)       # (R, R)
        s = s + bias
        m = jnp.max(s, axis=-1, keepdims=True)
        p = jnp.exp(s - m)
        denom = jnp.sum(p, axis=-1, keepdims=True)
        p = p * pl.reciprocal(denom, approx=True)
        ctx_heads.append(jnp.dot(p.astype(jnp.bfloat16), v_h,
                                 preferred_element_type=jnp.float32))     # (R, 128)
    ctx = jnp.concatenate(ctx_heads, axis=-1).astype(jnp.bfloat16)        # (R, OWR)

    # ---- attention output projection + residual + LayerNorm (fused) ----
    attn_out = jnp.dot(ctx, o_w_ref[0], preferred_element_type=jnp.float32) + o_b
    h1 = _layernorm_padded(x_f32 + attn_out, ln1_g, ln1_b)                # (R, HP) f32

    # ---- FFN (GELU) + residual + LayerNorm (fused) ----
    inter = jnp.dot(h1.astype(jnp.bfloat16), i_w_ref[0],
                    preferred_element_type=jnp.float32) + i_b
    inter = _gelu(inter)
    ffn_out = jnp.dot(inter.astype(jnp.bfloat16), f_w_ref[0],
                      preferred_element_type=jnp.float32) + f_b
    h2 = _layernorm_padded(h1 + ffn_out, ln2_g, ln2_b)
    x_scr[...] = h2.astype(jnp.bfloat16)

    # ---- last step: pooler (dense + tanh) + classifier head, all rows ----
    @pl.when(l == pl.num_programs(0) - 1)
    def _():
        xf = x_scr[...]                                        # (R, HP) bf16
        pooled = jnp.tanh(
            jnp.dot(xf, pooler_w_ref[...], preferred_element_type=jnp.float32)
            + head_vec_ref[0:1, :])
        out_ref[...] = (jnp.dot(pooled.astype(jnp.bfloat16), fc_w_ref[...],
                                preferred_element_type=jnp.float32)
                        + head_vec_ref[1:2, :])


# --------------------------- model forward ---------------------------

def bert_classifier_forward(packed, input_ids, attention_mask):
    B, S = input_ids.shape
    R = B * S

    # --- embeddings (gather is glue, plain JAX) ---
    pos_ids = jnp.arange(S)
    emb = (jnp.take(packed["word_emb"], input_ids, axis=0)
           + packed["pos_emb"][pos_ids][None, :, :]
           + packed["type_emb"][0][None, None, :])             # token_type_ids = 0
    emb = jnp.pad(emb, ((0, 0), (0, 0), (0, HP - HIDDEN)))     # zero-pad lanes
    x_emb = emb.reshape(R, HP).astype(jnp.float32)

    # Additive attention bias (R, R): 0 where query row b attends a valid key of the
    # SAME batch element, -1e9 otherwise (carries both key-padding and batch-block mask).
    m = attention_mask.astype(jnp.float32)                     # (B, S)
    valid = jnp.eye(B, dtype=jnp.float32)[:, None, :, None] * m[None, None, :, :]
    valid = jnp.broadcast_to(valid, (B, S, B, S)).reshape(R, R)
    attn_bias = (1.0 - valid) * (-1e9)

    layer_blk = lambda l: (l, 0, 0)
    const2 = lambda l: (0, 0)

    logits_all = pl.pallas_call(
        _bert_fused_kernel,
        out_shape=jax.ShapeDtypeStruct((R, NCP), jnp.float32),
        grid=(NUM_LAYERS,),
        in_specs=[
            pl.BlockSpec((R, HP), const2),                     # x_emb
            pl.BlockSpec((R, R), const2),                      # attention bias
            pl.BlockSpec((2, HP), const2),                     # [emb_ln_g, emb_ln_b]
            pl.BlockSpec((1, HP, QKVW), layer_blk),            # qkv_w (bf16, head-aligned)
            pl.BlockSpec((1, 1, QKVW), layer_blk),             # qkv_b
            pl.BlockSpec((1, OWR, HP), layer_blk),             # o_w (bf16, expanded rows)
            pl.BlockSpec((1, HP, IP), layer_blk),              # i_w (bf16)
            pl.BlockSpec((1, IP, HP), layer_blk),              # f_w (bf16)
            pl.BlockSpec((1, 8, HP), layer_blk),               # [o_b, ln1_g, ln1_b, i_b, f_b, ln2_g, ln2_b, 0]
            pl.BlockSpec((HP, HP), const2),                    # pooler_w (bf16)
            pl.BlockSpec((HP, NCP), const2),                   # fc_w (bf16)
            pl.BlockSpec((2, NCP), const2),                    # [pooler_b, fc_b]
        ],
        out_specs=pl.BlockSpec((R, NCP), const2),
        scratch_shapes=[pltpu.VMEM((R, HP), jnp.bfloat16)],    # persistent residual stream
        compiler_params=pltpu.CompilerParams(
            dimension_semantics=("arbitrary",)),
    )(x_emb, attn_bias, packed["emb_vec"],
      packed["qkv_w"], packed["qkv_b"], packed["o_w"], packed["i_w"], packed["f_w"],
      packed["vec"], packed["pooler_w"], packed["fc_w"], packed["head_vec"])

    # CLS rows are at stride S (row b*S); classes live in the first NUM_CLASSES lanes.
    return logits_all[::S, :NUM_CLASSES]


bert_classifier_forward_jit = jax.jit(bert_classifier_forward)


# --------------------------- parameter init & packing ---------------------------

def init_raw_params(key):
    std = 0.02

    def nrm(k, shape):
        return std * jax.random.normal(k, shape, dtype=jnp.float32)

    keys = iter(jax.random.split(key, 128))
    params = {
        "word_emb": nrm(next(keys), (VOCAB, HIDDEN)),
        "pos_emb": nrm(next(keys), (MAX_POS, HIDDEN)),
        "type_emb": nrm(next(keys), (TYPE_VOCAB, HIDDEN)),
        "emb_ln_g": jnp.ones((HIDDEN,), jnp.float32),
        "emb_ln_b": jnp.zeros((HIDDEN,), jnp.float32),
        "pooler_w": nrm(next(keys), (HIDDEN, HIDDEN)),
        "pooler_b": jnp.zeros((HIDDEN,), jnp.float32),
        "fc_w": nrm(next(keys), (HIDDEN, NUM_CLASSES)),
        "fc_b": jnp.zeros((NUM_CLASSES,), jnp.float32),
        "layers": [],
    }
    for _ in range(NUM_LAYERS):
        params["layers"].append({
            "q_w": nrm(next(keys), (HIDDEN, HIDDEN)), "q_b": jnp.zeros((HIDDEN,), jnp.float32),
            "k_w": nrm(next(keys), (HIDDEN, HIDDEN)), "k_b": jnp.zeros((HIDDEN,), jnp.float32),
            "v_w": nrm(next(keys), (HIDDEN, HIDDEN)), "v_b": jnp.zeros((HIDDEN,), jnp.float32),
            "o_w": nrm(next(keys), (HIDDEN, HIDDEN)), "o_b": jnp.zeros((HIDDEN,), jnp.float32),
            "ln1_g": jnp.ones((HIDDEN,), jnp.float32), "ln1_b": jnp.zeros((HIDDEN,), jnp.float32),
            "i_w": nrm(next(keys), (HIDDEN, INTERMEDIATE)), "i_b": jnp.zeros((INTERMEDIATE,), jnp.float32),
            "f_w": nrm(next(keys), (INTERMEDIATE, HIDDEN)), "f_b": jnp.zeros((HIDDEN,), jnp.float32),
            "ln2_g": jnp.ones((HIDDEN,), jnp.float32), "ln2_b": jnp.zeros((HIDDEN,), jnp.float32),
        })
    return params


def pack_params(raw):
    """Pad lane dims to 128, head-align QKV / expand o_w, fold attention scale into Q,
    stack per-layer weights along a leading layer axis, cast matmul weights to bf16."""

    def pad1(v, n):
        return jnp.pad(v, (0, n - v.shape[0]))

    def pad2(w, r, c):
        return jnp.pad(w, ((0, r - w.shape[0]), (0, c - w.shape[1])))

    scale = 1.0 / math.sqrt(HEAD_DIM)

    qkv_w_l, qkv_b_l, o_w_l, i_w_l, f_w_l, vec_l = [], [], [], [], [], []
    for lp in raw["layers"]:
        # head-aligned QKV: per head, three consecutive 128-lane blocks (q, k, v),
        # real HEAD_DIM columns in lanes [0:HEAD_DIM], zeros elsewhere.
        w_blocks, b_blocks = [], []
        for h in range(NUM_HEADS):
            lo, hi = h * HEAD_DIM, (h + 1) * HEAD_DIM
            for w, b, sc in ((lp["q_w"], lp["q_b"], scale),
                             (lp["k_w"], lp["k_b"], 1.0),
                             (lp["v_w"], lp["v_b"], 1.0)):
                blk = jnp.zeros((HP, HB), jnp.float32)
                blk = blk.at[:HIDDEN, :HEAD_DIM].set(w[:, lo:hi] * sc)
                w_blocks.append(blk)
                bb = jnp.zeros((HB,), jnp.float32).at[:HEAD_DIM].set(b[lo:hi] * sc)
                b_blocks.append(bb)
        qkv_w_l.append(jnp.concatenate(w_blocks, axis=1))            # (HP, QKVW)
        qkv_b_l.append(jnp.concatenate(b_blocks).reshape(1, QKVW))   # (1, QKVW)

        # o_w expanded to head-aligned rows: row block h carries the head's HEAD_DIM rows.
        o_w_exp = jnp.zeros((OWR, HP), jnp.float32)
        for h in range(NUM_HEADS):
            lo, hi = h * HEAD_DIM, (h + 1) * HEAD_DIM
            o_w_exp = o_w_exp.at[h * HB:h * HB + HEAD_DIM, :HIDDEN].set(lp["o_w"][lo:hi, :])
        o_w_l.append(o_w_exp)

        i_w_l.append(pad2(lp["i_w"], HP, IP))
        f_w_l.append(pad2(lp["f_w"], IP, HP))

        vec_l.append(jnp.stack([
            pad1(lp["o_b"], HP), pad1(lp["ln1_g"], HP), pad1(lp["ln1_b"], HP),
            pad1(lp["i_b"], IP), pad1(lp["f_b"], HP),
            pad1(lp["ln2_g"], HP), pad1(lp["ln2_b"], HP),
            jnp.zeros((HP,), jnp.float32)], axis=0))                 # (8, HP)

    packed = {
        "word_emb": raw["word_emb"],
        "pos_emb": raw["pos_emb"],
        "type_emb": raw["type_emb"],
        "emb_vec": jnp.stack([pad1(raw["emb_ln_g"], HP), pad1(raw["emb_ln_b"], HP)], axis=0),
        "qkv_w": jnp.stack(qkv_w_l, axis=0).astype(jnp.bfloat16),    # (L, HP, QKVW)
        "qkv_b": jnp.stack(qkv_b_l, axis=0),                         # (L, 1, QKVW)
        "o_w": jnp.stack(o_w_l, axis=0).astype(jnp.bfloat16),        # (L, OWR, HP)
        "i_w": jnp.stack(i_w_l, axis=0).astype(jnp.bfloat16),        # (L, HP, IP)
        "f_w": jnp.stack(f_w_l, axis=0).astype(jnp.bfloat16),        # (L, IP, HP)
        "vec": jnp.stack(vec_l, axis=0),                             # (L, 8, HP)
        "pooler_w": pad2(raw["pooler_w"], HP, HP).astype(jnp.bfloat16),
        "fc_w": pad2(raw["fc_w"], HP, NCP).astype(jnp.bfloat16),
        "head_vec": jnp.stack([pad1(raw["pooler_b"], HP), pad1(raw["fc_b"], NCP)], axis=0),
    }
    return packed


if __name__ == "__main__":
    B, S = 2, 8
    raw = init_raw_params(jax.random.PRNGKey(0))
    packed = pack_params(raw)

    kid, _ = jax.random.split(jax.random.PRNGKey(0))
    input_ids = jax.random.randint(kid, (B, S), 0, VOCAB, dtype=jnp.int32)
    attention_mask = jnp.array([[1] * S, [1] * 6 + [0] * 2], dtype=jnp.int32)

    logits = bert_classifier_forward_jit(packed, input_ids, attention_mask)
    logits = jax.block_until_ready(logits)
    assert logits.shape == (B, NUM_CLASSES)
    assert bool(jnp.all(jnp.isfinite(logits)))
    print("KERNEL_OK")
</pallas_src>

<mosaic_0001>
module attributes {stable_mosaic.version = 11 : i64} {
  func.func @_bert_fused_kernel(%arg0: i32, %arg1: memref<16x128xf32, #tpu.memory_space<vmem>>, %arg2: memref<16x16xf32, #tpu.memory_space<vmem>>, %arg3: memref<2x128xf32, #tpu.memory_space<vmem>>, %arg4: memref<1x128x1536xbf16, #tpu.memory_space<vmem>>, %arg5: memref<1x1x1536xf32, #tpu.memory_space<vmem>>, %arg6: memref<1x512x128xbf16, #tpu.memory_space<vmem>>, %arg7: memref<1x128x128xbf16, #tpu.memory_space<vmem>>, %arg8: memref<1x128x128xbf16, #tpu.memory_space<vmem>>, %arg9: memref<1x8x128xf32, #tpu.memory_space<vmem>>, %arg10: memref<128x128xbf16, #tpu.memory_space<vmem>>, %arg11: memref<128x128xbf16, #tpu.memory_space<vmem>>, %arg12: memref<2x128xf32, #tpu.memory_space<vmem>>, %arg13: memref<16x128xf32, #tpu.memory_space<vmem>>, %arg14: memref<16x128xbf16, #tpu.memory_space<vmem>>) attributes {dimension_semantics = [#tpu.dimension_semantics<arbitrary>], iteration_bounds = array<i64: 2>, scalar_prefetch = 0 : i64, scratch_operands = 1 : i64, tpu.core_type = #tpu.core_type<tc>, window_params = [{pipeline_mode = #tpu.pipeline_mode<synchronous>, transform_indices = @transform_0, window_bounds = array<i64: 16, 128>}, {pipeline_mode = #tpu.pipeline_mode<synchronous>, transform_indices = @transform_1, window_bounds = array<i64: 16, 16>}, {pipeline_mode = #tpu.pipeline_mode<synchronous>, transform_indices = @transform_2, window_bounds = array<i64: 2, 128>}, {transform_indices = @transform_3, window_bounds = array<i64: 1, 128, 1536>}, {transform_indices = @transform_4, window_bounds = array<i64: 1, 1, 1536>}, {transform_indices = @transform_5, window_bounds = array<i64: 1, 512, 128>}, {transform_indices = @transform_6, window_bounds = array<i64: 1, 128, 128>}, {transform_indices = @transform_7, window_bounds = array<i64: 1, 128, 128>}, {transform_indices = @transform_8, window_bounds = array<i64: 1, 8, 128>}, {pipeline_mode = #tpu.pipeline_mode<synchronous>, transform_indices = @transform_9, window_bounds = array<i64: 128, 128>}, {pipeline_mode = #tpu.pipeline_mode<synchronous>, transform_indices = @transform_10, window_bounds = array<i64: 128, 128>}, {pipeline_mode = #tpu.pipeline_mode<synchronous>, transform_indices = @transform_11, window_bounds = array<i64: 2, 128>}, {pipeline_mode = #tpu.pipeline_mode<synchronous>, transform_indices = @transform_12, window_bounds = array<i64: 16, 128>}]} {
    %c0_i32 = arith.constant 0 : i32
    %0 = arith.cmpi eq, %arg0, %c0_i32 : i32
    %1 = arith.extui %0 : i1 to i32
    %c0_i32_0 = arith.constant 0 : i32
    %2 = arith.cmpi ne, %1, %c0_i32_0 : i32
    scf.if %2 {
      %c0_60 = arith.constant 0 : index
      %c0_61 = arith.constant 0 : index
      %189 = vector.load %arg1[%c0_60, %c0_61] : memref<16x128xf32, #tpu.memory_space<vmem>>, vector<16x128xf32>
      %c0_62 = arith.constant 0 : index
      %c0_63 = arith.constant 0 : index
      %190 = vector.load %arg3[%c0_62, %c0_63] : memref<2x128xf32, #tpu.memory_space<vmem>>, vector<1x128xf32>
      %c1 = arith.constant 1 : index
      %c0_64 = arith.constant 0 : index
      %191 = vector.load %arg3[%c1, %c0_64] : memref<2x128xf32, #tpu.memory_space<vmem>>, vector<1x128xf32>
      %cst_65 = arith.constant dense<0.000000e+00> : vector<16xf32>
      %192 = vector.multi_reduction <add>, %189, %cst_65 [1] : vector<16x128xf32> to vector<16xf32>
      %193 = vector.shape_cast %192 : vector<16xf32> to vector<16x1xf32>
      %cst_66 = arith.constant 3.125000e-02 : f32
      %194 = vector.broadcast %cst_66 : f32 to vector<16x1xf32>
      %195 = arith.mulf %193, %194 : vector<16x1xf32>
      %196 = arith.mulf %189, %189 : vector<16x128xf32>
      %cst_67 = arith.constant dense<0.000000e+00> : vector<16xf32>
      %197 = vector.multi_reduction <add>, %196, %cst_67 [1] : vector<16x128xf32> to vector<16xf32>
      %198 = vector.shape_cast %197 : vector<16xf32> to vector<16x1xf32>
      %cst_68 = arith.constant 3.125000e-02 : f32
      %199 = vector.broadcast %cst_68 : f32 to vector<16x1xf32>
      %200 = arith.mulf %198, %199 : vector<16x1xf32>
      %201 = arith.mulf %195, %195 : vector<16x1xf32>
      %202 = arith.subf %200, %201 : vector<16x1xf32>
      %cst_69 = arith.constant 0.000000e+00 : f32
      %203 = vector.broadcast %cst_69 : f32 to vector<16x1xf32>
      %204 = arith.maximumf %202, %203 : vector<16x1xf32>
      %205 = vector.broadcast %195 : vector<16x1xf32> to vector<16x128xf32>
      %206 = arith.subf %189, %205 : vector<16x128xf32>
      %cst_70 = arith.constant 9.99999996E-13 : f32
      %207 = vector.broadcast %cst_70 : f32 to vector<16x1xf32>
      %208 = arith.addf %204, %207 : vector<16x1xf32>
      %209 = math.rsqrt %208 : vector<16x1xf32>
      %210 = vector.broadcast %209 : vector<16x1xf32> to vector<16x128xf32>
      %211 = arith.mulf %206, %210 : vector<16x128xf32>
      %212 = vector.broadcast %190 : vector<1x128xf32> to vector<16x128xf32>
      %213 = arith.mulf %211, %212 : vector<16x128xf32>
      %214 = vector.broadcast %191 : vector<1x128xf32> to vector<16x128xf32>
      %215 = arith.addf %213, %214 : vector<16x128xf32>
      %216 = arith.truncf %215 : vector<16x128xf32> to vector<16x128xbf16>
      %c0_71 = arith.constant 0 : index
      %c0_72 = arith.constant 0 : index
      %217 = vector.load %arg14[%c0_71, %c0_72] : memref<16x128xbf16, #tpu.memory_space<vmem>>, vector<16x128xbf16>
      tpu.vector_store %arg14[%c0_71, %c0_72], %216 {strides = array<i32>} : memref<16x128xbf16, #tpu.memory_space<vmem>>, vector<16x128xbf16>,
    } else {
    }
    %c0 = arith.constant 0 : index
    %c0_1 = arith.constant 0 : index
    %3 = vector.load %arg14[%c0, %c0_1] : memref<16x128xbf16, #tpu.memory_space<vmem>>, vector<16x128xbf16>
    %4 = arith.extf %3 : vector<16x128xbf16> to vector<16x128xf32>
    %c0_2 = arith.constant 0 : index
    %c0_3 = arith.constant 0 : index
    %c0_4 = arith.constant 0 : index
    %5 = vector.load %arg9[%c0_2, %c0_3, %c0_4] : memref<1x8x128xf32, #tpu.memory_space<vmem>>, vector<1x8x128xf32>
    %6 = vector.shape_cast %5 : vector<1x8x128xf32> to vector<8x128xf32>
    %7 = vector.extract_strided_slice %6 {offsets = [0, 0], sizes = [1, 128], strides = [1, 1]} : vector<8x128xf32> to vector<1x128xf32>
    %8 = vector.extract_strided_slice %6 {offsets = [1, 0], sizes = [1, 128], strides = [1, 1]} : vector<8x128xf32> to vector<1x128xf32>
    %9 = vector.extract_strided_slice %6 {offsets = [2, 0], sizes = [1, 128], strides = [1, 1]} : vector<8x128xf32> to vector<1x128xf32>
    %10 = vector.extract_strided_slice %6 {offsets = [3, 0], sizes = [1, 128], strides = [1, 1]} : vector<8x128xf32> to vector<1x128xf32>
    %11 = vector.extract_strided_slice %6 {offsets = [4, 0], sizes = [1, 128], strides = [1, 1]} : vector<8x128xf32> to vector<1x128xf32>
    %12 = vector.extract_strided_slice %6 {offsets = [5, 0], sizes = [1, 128], strides = [1, 1]} : vector<8x128xf32> to vector<1x128xf32>
    %13 = vector.extract_strided_slice %6 {offsets = [6, 0], sizes = [1, 128], strides = [1, 1]} : vector<8x128xf32> to vector<1x128xf32>
    %c0_5 = arith.constant 0 : index
    %c0_6 = arith.constant 0 : index
    %c0_7 = arith.constant 0 : index
    %14 = vector.load %arg4[%c0_5, %c0_6, %c0_7] : memref<1x128x1536xbf16, #tpu.memory_space<vmem>>, vector<1x128x1536xbf16>
    %15 = vector.shape_cast %14 : vector<1x128x1536xbf16> to vector<128x1536xbf16>
    %cst = arith.constant dense<0.000000e+00> : vector<16x1536xf32>
    %16 = tpu.matmul %3, %15, %cst {dimension_numbers = #tpu.dot_dimension_numbers<[1], [0], [0], [1], [0, 0, 1, 1], [], []>} : vector<16x128xbf16>, vector<128x1536xbf16>, vector<16x1536xf32> -> vector<16x1536xf32>
    %c0_8 = arith.constant 0 : index
    %c0_9 = arith.constant 0 : index
    %c0_10 = arith.constant 0 : index
    %17 = vector.load %arg5[%c0_8, %c0_9, %c0_10] : memref<1x1x1536xf32, #tpu.memory_space<vmem>>, vector<1x1x1536xf32>
    %18 = vector.shape_cast %17 : vector<1x1x1536xf32> to vector<1x1536xf32>
    %19 = vector.broadcast %18 : vector<1x1536xf32> to vector<16x1536xf32>
    %20 = arith.addf %16, %19 : vector<16x1536xf32>
    %c0_11 = arith.constant 0 : index
    %c0_12 = arith.constant 0 : index
    %21 = vector.load %arg2[%c0_11, %c0_12] : memref<16x16xf32, #tpu.memory_space<vmem>>, vector<16x16xf32>
    %22 = vector.extract_strided_slice %20 {offsets = [0, 0], sizes = [16, 128], strides = [1, 1]} : vector<16x1536xf32> to vector<16x128xf32>
    %23 = arith.truncf %22 : vector<16x128xf32> to vector<16x128xbf16>
    %24 = vector.extract_strided_slice %20 {offsets = [0, 128], sizes = [16, 128], strides = [1, 1]} : vector<16x1536xf32> to vector<16x128xf32>
    %25 = arith.truncf %24 : vector<16x128xf32> to vector<16x128xbf16>
    %26 = vector.extract_strided_slice %20 {offsets = [0, 256], sizes = [16, 128], strides = [1, 1]} : vector<16x1536xf32> to vector<16x128xf32>
    %27 = arith.truncf %26 : vector<16x128xf32> to vector<16x128xbf16>
    %cst_13 = arith.constant dense<0.000000e+00> : vector<16x16xf32>
    %28 = tpu.matmul %23, %25, %cst_13 {dimension_numbers = #tpu.dot_dimension_numbers<[1], [1], [0], [0], [0, 0, 1, 0], [], []>} : vector<16x128xbf16>, vector<16x128xbf16>, vector<16x16xf32> -> vector<16x16xf32>
    %29 = arith.addf %28, %21 : vector<16x16xf32>
    %cst_14 = arith.constant dense<0xFF800000> : vector<16xf32>
    %30 = vector.multi_reduction <maximumf>, %29, %cst_14 [1] : vector<16x16xf32> to vector<16xf32>
    %31 = vector.shape_cast %30 : vector<16xf32> to vector<16x1xf32>
    %32 = vector.broadcast %31 : vector<16x1xf32> to vector<16x16xf32>
    %33 = arith.subf %29, %32 : vector<16x16xf32>
    %34 = math.exp %33 : vector<16x16xf32>
    %cst_15 = arith.constant dense<0.000000e+00> : vector<16xf32>
    %35 = vector.multi_reduction <add>, %34, %cst_15 [1] : vector<16x16xf32> to vector<16xf32>
    %36 = vector.shape_cast %35 : vector<16xf32> to vector<16x1xf32>
    %37 = tpu.reciprocal %36 {approx = true} : vector<16x1xf32> -> vector<16x1xf32>
    %38 = vector.broadcast %37 : vector<16x1xf32> to vector<16x16xf32>
    %39 = arith.mulf %34, %38 : vector<16x16xf32>
    %40 = arith.truncf %39 : vector<16x16xf32> to vector<16x16xbf16>
    %cst_16 = arith.constant dense<0.000000e+00> : vector<16x128xf32>
    %41 = tpu.matmul %40, %27, %cst_16 {dimension_numbers = #tpu.dot_dimension_numbers<[1], [0], [0], [1], [0, 0, 1, 1], [], []>} : vector<16x16xbf16>, vector<16x128xbf16>, vector<16x128xf32> -> vector<16x128xf32>
    %42 = vector.extract_strided_slice %20 {offsets = [0, 384], sizes = [16, 128], strides = [1, 1]} : vector<16x1536xf32> to vector<16x128xf32>
    %43 = arith.truncf %42 : vector<16x128xf32> to vector<16x128xbf16>
    %44 = vector.extract_strided_slice %20 {offsets = [0, 512], sizes = [16, 128], strides = [1, 1]} : vector<16x1536xf32> to vector<16x128xf32>
    %45 = arith.truncf %44 : vector<16x128xf32> to vector<16x128xbf16>
    %46 = vector.extract_strided_slice %20 {offsets = [0, 640], sizes = [16, 128], strides = [1, 1]} : vector<16x1536xf32> to vector<16x128xf32>
    %47 = arith.truncf %46 : vector<16x128xf32> to vector<16x128xbf16>
    %cst_17 = arith.constant dense<0.000000e+00> : vector<16x16xf32>
    %48 = tpu.matmul %43, %45, %cst_17 {dimension_numbers = #tpu.dot_dimension_numbers<[1], [1], [0], [0], [0, 0, 1, 0], [], []>} : vector<16x128xbf16>, vector<16x128xbf16>, vector<16x16xf32> -> vector<16x16xf32>
    %49 = arith.addf %48, %21 : vector<16x16xf32>
    %cst_18 = arith.constant dense<0xFF800000> : vector<16xf32>
    %50 = vector.multi_reduction <maximumf>, %49, %cst_18 [1] : vector<16x16xf32> to vector<16xf32>
    %51 = vector.shape_cast %50 : vector<16xf32> to vector<16x1xf32>
    %52 = vector.broadcast %51 : vector<16x1xf32> to vector<16x16xf32>
    %53 = arith.subf %49, %52 : vector<16x16xf32>
    %54 = math.exp %53 : vector<16x16xf32>
    %cst_19 = arith.constant dense<0.000000e+00> : vector<16xf32>
    %55 = vector.multi_reduction <add>, %54, %cst_19 [1] : vector<16x16xf32> to vector<16xf32>
    %56 = vector.shape_cast %55 : vector<16xf32> to vector<16x1xf32>
    %57 = tpu.reciprocal %56 {approx = true} : vector<16x1xf32> -> vector<16x1xf32>
    %58 = vector.broadcast %57 : vector<16x1xf32> to vector<16x16xf32>
    %59 = arith.mulf %54, %58 : vector<16x16xf32>
    %60 = arith.truncf %59 : vector<16x16xf32> to vector<16x16xbf16>
    %cst_20 = arith.constant dense<0.000000e+00> : vector<16x128xf32>
    %61 = tpu.matmul %60, %47, %cst_20 {dimension_numbers = #tpu.dot_dimension_numbers<[1], [0], [0], [1], [0, 0, 1, 1], [], []>} : vector<16x16xbf16>, vector<16x128xbf16>, vector<16x128xf32> -> vector<16x128xf32>
    %62 = vector.extract_strided_slice %20 {offsets = [0, 768], sizes = [16, 128], strides = [1, 1]} : vector<16x1536xf32> to vector<16x128xf32>
    %63 = arith.truncf %62 : vector<16x128xf32> to vector<16x128xbf16>
    %64 = vector.extract_strided_slice %20 {offsets = [0, 896], sizes = [16, 128], strides = [1, 1]} : vector<16x1536xf32> to vector<16x128xf32>
    %65 = arith.truncf %64 : vector<16x128xf32> to vector<16x128xbf16>
    %66 = vector.extract_strided_slice %20 {offsets = [0, 1024], sizes = [16, 128], strides = [1, 1]} : vector<16x1536xf32> to vector<16x128xf32>
    %67 = arith.truncf %66 : vector<16x128xf32> to vector<16x128xbf16>
    %cst_21 = arith.constant dense<0.000000e+00> : vector<16x16xf32>
    %68 = tpu.matmul %63, %65, %cst_21 {dimension_numbers = #tpu.dot_dimension_numbers<[1], [1], [0], [0], [0, 0, 1, 0], [], []>} : vector<16x128xbf16>, vector<16x128xbf16>, vector<16x16xf32> -> vector<16x16xf32>
    %69 = arith.addf %68, %21 : vector<16x16xf32>
    %cst_22 = arith.constant dense<0xFF800000> : vector<16xf32>
    %70 = vector.multi_reduction <maximumf>, %69, %cst_22 [1] : vector<16x16xf32> to vector<16xf32>
    %71 = vector.shape_cast %70 : vector<16xf32> to vector<16x1xf32>
    %72 = vector.broadcast %71 : vector<16x1xf32> to vector<16x16xf32>
    %73 = arith.subf %69, %72 : vector<16x16xf32>
    %74 = math.exp %73 : vector<16x16xf32>
    %cst_23 = arith.constant dense<0.000000e+00> : vector<16xf32>
    %75 = vector.multi_reduction <add>, %74, %cst_23 [1] : vector<16x16xf32> to vector<16xf32>
    %76 = vector.shape_cast %75 : vector<16xf32> to vector<16x1xf32>
    %77 = tpu.reciprocal %76 {approx = true} : vector<16x1xf32> -> vector<16x1xf32>
    %78 = vector.broadcast %77 : vector<16x1xf32> to vector<16x16xf32>
    %79 = arith.mulf %74, %78 : vector<16x16xf32>
    %80 = arith.truncf %79 : vector<16x16xf32> to vector<16x16xbf16>
    %cst_24 = arith.constant dense<0.000000e+00> : vector<16x128xf32>
    %81 = tpu.matmul %80, %67, %cst_24 {dimension_numbers = #tpu.dot_dimension_numbers<[1], [0], [0], [1], [0, 0, 1, 1], [], []>} : vector<16x16xbf16>, vector<16x128xbf16>, vector<16x128xf32> -> vector<16x128xf32>
    %82 = vector.extract_strided_slice %20 {offsets = [0, 1152], sizes = [16, 128], strides = [1, 1]} : vector<16x1536xf32> to vector<16x128xf32>
    %83 = arith.truncf %82 : vector<16x128xf32> to vector<16x128xbf16>
    %84 = vector.extract_strided_slice %20 {offsets = [0, 1280], sizes = [16, 128], strides = [1, 1]} : vector<16x1536xf32> to vector<16x128xf32>
    %85 = arith.truncf %84 : vector<16x128xf32> to vector<16x128xbf16>
    %86 = vector.extract_strided_slice %20 {offsets = [0, 1408], sizes = [16, 128], strides = [1, 1]} : vector<16x1536xf32> to vector<16x128xf32>
    %87 = arith.truncf %86 : vector<16x128xf32> to vector<16x128xbf16>
    %cst_25 = arith.constant dense<0.000000e+00> : vector<16x16xf32>
    %88 = tpu.matmul %83, %85, %cst_25 {dimension_numbers = #tpu.dot_dimension_numbers<[1], [1], [0], [0], [0, 0, 1, 0], [], []>} : vector<16x128xbf16>, vector<16x128xbf16>, vector<16x16xf32> -> vector<16x16xf32>
    %89 = arith.addf %88, %21 : vector<16x16xf32>
    %cst_26 = arith.constant dense<0xFF800000> : vector<16xf32>
    %90 = vector.multi_reduction <maximumf>, %89, %cst_26 [1] : vector<16x16xf32> to vector<16xf32>
    %91 = vector.shape_cast %90 : vector<16xf32> to vector<16x1xf32>
    %92 = vector.broadcast %91 : vector<16x1xf32> to vector<16x16xf32>
    %93 = arith.subf %89, %92 : vector<16x16xf32>
    %94 = math.exp %93 : vector<16x16xf32>
    %cst_27 = arith.constant dense<0.000000e+00> : vector<16xf32>
    %95 = vector.multi_reduction <add>, %94, %cst_27 [1] : vector<16x16xf32> to vector<16xf32>
    %96 = vector.shape_cast %95 : vector<16xf32> to vector<16x1xf32>
    %97 = tpu.reciprocal %96 {approx = true} : vector<16x1xf32> -> vector<16x1xf32>
    %98 = vector.broadcast %97 : vector<16x1xf32> to vector<16x16xf32>
    %99 = arith.mulf %94, %98 : vector<16x16xf32>
    %100 = arith.truncf %99 : vector<16x16xf32> to vector<16x16xbf16>
    %cst_28 = arith.constant dense<0.000000e+00> : vector<16x128xf32>
    %101 = tpu.matmul %100, %87, %cst_28 {dimension_numbers = #tpu.dot_dimension_numbers<[1], [0], [0], [1], [0, 0, 1, 1], [], []>} : vector<16x16xbf16>, vector<16x128xbf16>, vector<16x128xf32> -> vector<16x128xf32>
    %102 = tpu.concatenate %41, %61, %81, %101 in 1 : vector<16x128xf32>, vector<16x128xf32>, vector<16x128xf32>, vector<16x128xf32> -> vector<16x512xf32>
    %103 = arith.truncf %102 : vector<16x512xf32> to vector<16x512xbf16>
    %c0_29 = arith.constant 0 : index
    %c0_30 = arith.constant 0 : index
    %c0_31 = arith.constant 0 : index
    %104 = vector.load %arg6[%c0_29, %c0_30, %c0_31] : memref<1x512x128xbf16, #tpu.memory_space<vmem>>, vector<1x512x128xbf16>
    %105 = vector.shape_cast %104 : vector<1x512x128xbf16> to vector<512x128xbf16>
    %cst_32 = arith.constant dense<0.000000e+00> : vector<16x128xf32>
    %106 = tpu.matmul %103, %105, %cst_32 {dimension_numbers = #tpu.dot_dimension_numbers<[1], [0], [0], [1], [0, 0, 1, 1], [], []>} : vector<16x512xbf16>, vector<512x128xbf16>, vector<16x128xf32> -> vector<16x128xf32>
    %107 = vector.broadcast %7 : vector<1x128xf32> to vector<16x128xf32>
    %108 = arith.addf %106, %107 : vector<16x128xf32>
    %109 = arith.addf %4, %108 : vector<16x128xf32>
    %cst_33 = arith.constant dense<0.000000e+00> : vector<16xf32>
    %110 = vector.multi_reduction <add>, %109, %cst_33 [1] : vector<16x128xf32> to vector<16xf32>
    %111 = vector.shape_cast %110 : vector<16xf32> to vector<16x1xf32>
    %cst_34 = arith.constant 3.125000e-02 : f32
    %112 = vector.broadcast %cst_34 : f32 to vector<16x1xf32>
    %113 = arith.mulf %111, %112 : vector<16x1xf32>
    %114 = arith.mulf %109, %109 : vector<16x128xf32>
    %cst_35 = arith.constant dense<0.000000e+00> : vector<16xf32>
    %115 = vector.multi_reduction <add>, %114, %cst_35 [1] : vector<16x128xf32> to vector<16xf32>
    %116 = vector.shape_cast %115 : vector<16xf32> to vector<16x1xf32>
    %cst_36 = arith.constant 3.125000e-02 : f32
    %117 = vector.broadcast %cst_36 : f32 to vector<16x1xf32>
    %118 = arith.mulf %116, %117 : vector<16x1xf32>
    %119 = arith.mulf %113, %113 : vector<16x1xf32>
    %120 = arith.subf %118, %119 : vector<16x1xf32>
    %cst_37 = arith.constant 0.000000e+00 : f32
    %121 = vector.broadcast %cst_37 : f32 to vector<16x1xf32>
    %122 = arith.maximumf %120, %121 : vector<16x1xf32>
    %123 = vector.broadcast %113 : vector<16x1xf32> to vector<16x128xf32>
    %124 = arith.subf %109, %123 : vector<16x128xf32>
    %cst_38 = arith.constant 9.99999996E-13 : f32
    %125 = vector.broadcast %cst_38 : f32 to vector<16x1xf32>
    %126 = arith.addf %122, %125 : vector<16x1xf32>
    %127 = math.rsqrt %126 : vector<16x1xf32>
    %128 = vector.broadcast %127 : vector<16x1xf32> to vector<16x128xf32>
    %129 = arith.mulf %124, %128 : vector<16x128xf32>
    %130 = vector.broadcast %8 : vector<1x128xf32> to vector<16x128xf32>
    %131 = arith.mulf %129, %130 : vector<16x128xf32>
    %132 = vector.broadcast %9 : vector<1x128xf32> to vector<16x128xf32>
    %133 = arith.addf %131, %132 : vector<16x128xf32>
    %134 = arith.truncf %133 : vector<16x128xf32> to vector<16x128xbf16>
    %c0_39 = arith.constant 0 : index
    %c0_40 = arith.constant 0 : index
    %c0_41 = arith.constant 0 : index
    %135 = vector.load %arg7[%c0_39, %c0_40, %c0_41] : memref<1x128x128xbf16, #tpu.memory_space<vmem>>, vector<1x128x128xbf16>
    %136 = vector.shape_cast %135 : vector<1x128x128xbf16> to vector<128x128xbf16>
    %cst_42 = arith.constant dense<0.000000e+00> : vector<16x128xf32>
    %137 = tpu.matmul %134, %136, %cst_42 {dimension_numbers = #tpu.dot_dimension_numbers<[1], [0], [0], [1], [0, 0, 1, 1], [], []>} : vector<16x128xbf16>, vector<128x128xbf16>, vector<16x128xf32> -> vector<16x128xf32>
    %138 = vector.broadcast %10 : vector<1x128xf32> to vector<16x128xf32>
    %139 = arith.addf %137, %138 : vector<16x128xf32>
    %cst_43 = arith.constant 5.000000e-01 : f32
    %140 = vector.broadcast %cst_43 : f32 to vector<16x128xf32>
    %141 = arith.mulf %140, %139 : vector<16x128xf32>
    %cst_44 = arith.constant 4.471500e-02 : f32
    %142 = vector.broadcast %cst_44 : f32 to vector<16x128xf32>
    %143 = arith.mulf %142, %139 : vector<16x128xf32>
    %144 = arith.mulf %143, %139 : vector<16x128xf32>
    %145 = arith.mulf %144, %139 : vector<16x128xf32>
    %146 = arith.addf %139, %145 : vector<16x128xf32>
    %cst_45 = arith.constant 0.797884583 : f32
    %147 = vector.broadcast %cst_45 : f32 to vector<16x128xf32>
    %148 = arith.mulf %147, %146 : vector<16x128xf32>
    %149 = math.tanh %148 : vector<16x128xf32>
    %cst_46 = arith.constant 1.000000e+00 : f32
    %150 = vector.broadcast %cst_46 : f32 to vector<16x128xf32>
    %151 = arith.addf %150, %149 : vector<16x128xf32>
    %152 = arith.mulf %141, %151 : vector<16x128xf32>
    %153 = arith.truncf %152 : vector<16x128xf32> to vector<16x128xbf16>
    %c0_47 = arith.constant 0 : index
    %c0_48 = arith.constant 0 : index
    %c0_49 = arith.constant 0 : index
    %154 = vector.load %arg8[%c0_47, %c0_48, %c0_49] : memref<1x128x128xbf16, #tpu.memory_space<vmem>>, vector<1x128x128xbf16>
    %155 = vector.shape_cast %154 : vector<1x128x128xbf16> to vector<128x128xbf16>
    %cst_50 = arith.constant dense<0.000000e+00> : vector<16x128xf32>
    %156 = tpu.matmul %153, %155, %cst_50 {dimension_numbers = #tpu.dot_dimension_numbers<[1], [0], [0], [1], [0, 0, 1, 1], [], []>} : vector<16x128xbf16>, vector<128x128xbf16>, vector<16x128xf32> -> vector<16x128xf32>
    %157 = vector.broadcast %11 : vector<1x128xf32> to vector<16x128xf32>
    %158 = arith.addf %156, %157 : vector<16x128xf32>
    %159 = arith.addf %133, %158 : vector<16x128xf32>
    %cst_51 = arith.constant dense<0.000000e+00> : vector<16xf32>
    %160 = vector.multi_reduction <add>, %159, %cst_51 [1] : vector<16x128xf32> to vector<16xf32>
    %161 = vector.shape_cast %160 : vector<16xf32> to vector<16x1xf32>
    %cst_52 = arith.constant 3.125000e-02 : f32
    %162 = vector.broadcast %cst_52 : f32 to vector<16x1xf32>
    %163 = arith.mulf %161, %162 : vector<16x1xf32>
    %164 = arith.mulf %159, %159 : vector<16x128xf32>
    %cst_53 = arith.constant dense<0.000000e+00> : vector<16xf32>
    %165 = vector.multi_reduction <add>, %164, %cst_53 [1] : vector<16x128xf32> to vector<16xf32>
    %166 = vector.shape_cast %165 : vector<16xf32> to vector<16x1xf32>
    %cst_54 = arith.constant 3.125000e-02 : f32
    %167 = vector.broadcast %cst_54 : f32 to vector<16x1xf32>
    %168 = arith.mulf %166, %167 : vector<16x1xf32>
    %169 = arith.mulf %163, %163 : vector<16x1xf32>
    %170 = arith.subf %168, %169 : vector<16x1xf32>
    %cst_55 = arith.constant 0.000000e+00 : f32
    %171 = vector.broadcast %cst_55 : f32 to vector<16x1xf32>
    %172 = arith.maximumf %170, %171 : vector<16x1xf32>
    %173 = vector.broadcast %163 : vector<16x1xf32> to vector<16x128xf32>
    %174 = arith.subf %159, %173 : vector<16x128xf32>
    %cst_56 = arith.constant 9.99999996E-13 : f32
    %175 = vector.broadcast %cst_56 : f32 to vector<16x1xf32>
    %176 = arith.addf %172, %175 : vector<16x1xf32>
    %177 = math.rsqrt %176 : vector<16x1xf32>
    %178 = vector.broadcast %177 : vector<16x1xf32> to vector<16x128xf32>
    %179 = arith.mulf %174, %178 : vector<16x128xf32>
    %180 = vector.broadcast %12 : vector<1x128xf32> to vector<16x128xf32>
    %181 = arith.mulf %179, %180 : vector<16x128xf32>
    %182 = vector.broadcast %13 : vector<1x128xf32> to vector<16x128xf32>
    %183 = arith.addf %181, %182 : vector<16x128xf32>
    %184 = arith.truncf %183 : vector<16x128xf32> to vector<16x128xbf16>
    %c0_57 = arith.constant 0 : index
    %c0_58 = arith.constant 0 : index
    %185 = vector.load %arg14[%c0_57, %c0_58] : memref<16x128xbf16, #tpu.memory_space<vmem>>, vector<16x128xbf16>
    tpu.vector_store %arg14[%c0_57, %c0_58], %184 {strides = array<i32>} : memref<16x128xbf16, #tpu.memory_space<vmem>>, vector<16x128xbf16>,
    %c1_i32 = arith.constant 1 : i32
    %186 = arith.cmpi eq, %arg0, %c1_i32 : i32
    %187 = arith.extui %186 : i1 to i32
    %c0_i32_59 = arith.constant 0 : i32
    %188 = arith.cmpi ne, %187, %c0_i32_59 : i32
    scf.if %188 {
      %c0_60 = arith.constant 0 : index
      %c0_61 = arith.constant 0 : index
      %189 = vector.load %arg14[%c0_60, %c0_61] : memref<16x128xbf16, #tpu.memory_space<vmem>>, vector<16x128xbf16>
      %c0_62 = arith.constant 0 : index
      %c0_63 = arith.constant 0 : index
      %190 = vector.load %arg10[%c0_62, %c0_63] : memref<128x128xbf16, #tpu.memory_space<vmem>>, vector<128x128xbf16>
      %cst_64 = arith.constant dense<0.000000e+00> : vector<16x128xf32>
      %191 = tpu.matmul %189, %190, %cst_64 {dimension_numbers = #tpu.dot_dimension_numbers<[1], [0], [0], [1], [0, 0, 1, 1], [], []>} : vector<16x128xbf16>, vector<128x128xbf16>, vector<16x128xf32> -> vector<16x128xf32>
      %c0_65 = arith.constant 0 : index
      %c0_66 = arith.constant 0 : index
      %192 = vector.load %arg12[%c0_65, %c0_66] : memref<2x128xf32, #tpu.memory_space<vmem>>, vector<1x128xf32>
      %193 = vector.broadcast %192 : vector<1x128xf32> to vector<16x128xf32>
      %194 = arith.addf %191, %193 : vector<16x128xf32>
      %195 = math.tanh %194 : vector<16x128xf32>
      %196 = arith.truncf %195 : vector<16x128xf32> to vector<16x128xbf16>
      %c0_67 = arith.constant 0 : index
      %c0_68 = arith.constant 0 : index
      %197 = vector.load %arg11[%c0_67, %c0_68] : memref<128x128xbf16, #tpu.memory_space<vmem>>, vector<128x128xbf16>
      %cst_69 = arith.constant dense<0.000000e+00> : vector<16x128xf32>
      %198 = tpu.matmul %196, %197, %cst_69 {dimension_numbers = #tpu.dot_dimension_numbers<[1], [0], [0], [1], [0, 0, 1, 1], [], []>} : vector<16x128xbf16>, vector<128x128xbf16>, vector<16x128xf32> -> vector<16x128xf32>
      %c1 = arith.constant 1 : index
      %c0_70 = arith.constant 0 : index
      %199 = vector.load %arg12[%c1, %c0_70] : memref<2x128xf32, #tpu.memory_space<vmem>>, vector<1x128xf32>
      %200 = vector.broadcast %199 : vector<1x128xf32> to vector<16x128xf32>
      %201 = arith.addf %198, %200 : vector<16x128xf32>
      %c0_71 = arith.constant 0 : index
      %c0_72 = arith.constant 0 : index
      %202 = vector.load %arg13[%c0_71, %c0_72] : memref<16x128xf32, #tpu.memory_space<vmem>>, vector<16x128xf32>
      tpu.vector_store %arg13[%c0_71, %c0_72], %201 {strides = array<i32>} : memref<16x128xf32, #tpu.memory_space<vmem>>, vector<16x128xf32>,
    } else {
    }
    return
  }
  func.func @transform_0(%arg0: i32) -> (i32, i32) {
    %c0_i32 = arith.constant 0 : i32
    %c0_i32_0 = arith.constant 0 : i32
    %c0_i32_1 = arith.constant 0 : i32
    return %c0_i32, %c0_i32_0 : i32, i32
  }
  func.func @transform_1(%arg0: i32) -> (i32, i32) {
    %c0_i32 = arith.constant 0 : i32
    %c0_i32_0 = arith.constant 0 : i32
    %c0_i32_1 = arith.constant 0 : i32
    return %c0_i32, %c0_i32_0 : i32, i32
  }
  func.func @transform_2(%arg0: i32) -> (i32, i32) {
    %c0_i32 = arith.constant 0 : i32
    %c0_i32_0 = arith.constant 0 : i32
    %c0_i32_1 = arith.constant 0 : i32
    return %c0_i32, %c0_i32_0 : i32, i32
  }
  func.func @transform_3(%arg0: i32) -> (i32, i32, i32) {
    %c0_i32 = arith.constant 0 : i32
    %c0_i32_0 = arith.constant 0 : i32
    %c0_i32_1 = arith.constant 0 : i32
    return %arg0, %c0_i32, %c0_i32_0 : i32, i32, i32
  }
  func.func @transform_4(%arg0: i32) -> (i32, i32, i32) {
    %c0_i32 = arith.constant 0 : i32
    %c0_i32_0 = arith.constant 0 : i32
    %c0_i32_1 = arith.constant 0 : i32
    return %arg0, %c0_i32, %c0_i32_0 : i32, i32, i32
  }
  func.func @transform_5(%arg0: i32) -> (i32, i32, i32) {
    %c0_i32 = arith.constant 0 : i32
    %c0_i32_0 = arith.constant 0 : i32
    %c0_i32_1 = arith.constant 0 : i32
    return %arg0, %c0_i32, %c0_i32_0 : i32, i32, i32
  }
  func.func @transform_6(%arg0: i32) -> (i32, i32, i32) {
    %c0_i32 = arith.constant 0 : i32
    %c0_i32_0 = arith.constant 0 : i32
    %c0_i32_1 = arith.constant 0 : i32
    return %arg0, %c0_i32, %c0_i32_0 : i32, i32, i32
  }
  func.func @transform_7(%arg0: i32) -> (i32, i32, i32) {
    %c0_i32 = arith.constant 0 : i32
    %c0_i32_0 = arith.constant 0 : i32
    %c0_i32_1 = arith.constant 0 : i32
    return %arg0, %c0_i32, %c0_i32_0 : i32, i32, i32
  }
  func.func @transform_8(%arg0: i32) -> (i32, i32, i32) {
    %c0_i32 = arith.constant 0 : i32
    %c0_i32_0 = arith.constant 0 : i32
    %c0_i32_1 = arith.constant 0 : i32
    return %arg0, %c0_i32, %c0_i32_0 : i32, i32, i32
  }
  func.func @transform_9(%arg0: i32) -> (i32, i32) {
    %c0_i32 = arith.constant 0 : i32
    %c0_i32_0 = arith.constant 0 : i32
    %c0_i32_1 = arith.constant 0 : i32
    return %c0_i32, %c0_i32_0 : i32, i32
  }
  func.func @transform_10(%arg0: i32) -> (i32, i32) {
    %c0_i32 = arith.constant 0 : i32
    %c0_i32_0 = arith.constant 0 : i32
    %c0_i32_1 = arith.constant 0 : i32
    return %c0_i32, %c0_i32_0 : i32, i32
  }
  func.func @transform_11(%arg0: i32) -> (i32, i32) {
    %c0_i32 = arith.constant 0 : i32
    %c0_i32_0 = arith.constant 0 : i32
    %c0_i32_1 = arith.constant 0 : i32
    return %c0_i32, %c0_i32_0 : i32, i32
  }
  func.func @transform_12(%arg0: i32) -> (i32, i32) {
    %c0_i32 = arith.constant 0 : i32
    %c0_i32_0 = arith.constant 0 : i32
    %c0_i32_1 = arith.constant 0 : i32
    return %c0_i32, %c0_i32_0 : i32, i32
  }
}

</mosaic_0001>

<bundles_post_ra>
// kernel: bert_classifier_forward.1
= control target key start
LH: loop header
LB: loop body
LE: loop exit
PB: predicated region body
PF: predicated region fallthrough
CT: control target
= control target key end

     0   :  { %s4690_s0 = inlined_call_operand.vmem [shape: f32[16,128], index: 0, kind: input, shape index: {}]   ;;  %s4691_s1 = inlined_call_operand.vmem [shape: f32[16,16], index: 1, kind: input, shape index: {}]   ;;  %s4692_s2 = inlined_call_operand.vmem [shape: f32[2,128], index: 2, kind: input, shape index: {}]   ;;  %s4693_s3 = inlined_call_operand.hbm [shape: bf16[2,128,1536], index: 3, kind: input, shape index: {}]   ;;  %s4694_s4 = inlined_call_operand.vmem [shape: f32[2,1,1536], index: 4, kind: input, shape index: {}]   ;;  %s4695_s5 = inlined_call_operand.vmem [shape: bf16[2,512,128], index: 5, kind: input, shape index: {}]   ;;  %s4696_s6 = inlined_call_operand.hbm [shape: bf16[2,128,128], index: 6, kind: input, shape index: {}]   ;;  %s4697_s7 = inlined_call_operand.hbm [shape: bf16[2,128,128], index: 7, kind: input, shape index: {}]   ;;  %s4698_s8 = inlined_call_operand.vmem [shape: f32[2,8,128], index: 8, kind: input, shape index: {}]   ;;  %s4699_s9 = inlined_call_operand.hbm [shape: bf16[128,128], index: 9, kind: input, shape index: {}]   ;;  %s4700_s10 = inlined_call_operand.hbm [shape: bf16[128,128], index: 10, kind: input, shape index: {}]   ;;  %s4701_s11 = inlined_call_operand.vmem [shape: f32[2,128], index: 11, kind: input, shape index: {}]   ;;  %s4702_s12 = inlined_call_operand.vmem [shape: f32[16,128], index: 12, kind: output, shape index: {}]  }
   0x1   :  { %4718 = sst [smem:[#allocation17_spill]] %s4691_s1 }
   0x2   :  { %4719 = sst [smem:[#allocation18_spill]] %s4692_s2 }
   0x3   :  { %4720 = sst [smem:[#allocation19_spill]] %s4696_s6 }
   0x4   :  { %4721 = sst [smem:[#allocation20_spill]] %s4699_s9 }
   0x5   :  { %4722 = sst [smem:[#allocation21_spill]] %s4701_s11 }
   0x6   :  { %4723 = sst [smem:[#allocation22_spill]] %s4702_s12 }
   0x7   :  { %17 = vsyncpa [#allocation4], 0 }
   0x8   :  { %19 = vsyncpa [#allocation4 + $0x1], 0 }
   0x9   :  { %20 = vsyncpa [#allocation6], 0 }
   0xa   :  { %22 = vsyncpa [#allocation6 + $0x1], 0 }
   0xb   :  { %23 = vsyncpa [#allocation9], 0  ;;  %s4091_s21 = smov 0   ;;  %s4093_s22 = smov 0  }
   0xc   :  { %s4095_s23 = smov 0   ;;  %s4097_s24 = smov 0  }
   0xd LB: > { %4724 = sst [smem:[#allocation14_spill]] %s4006_s23  ;;  %s4110_s25 = sadd.s32 4294967295, %s4010_s24   ;;  %s4010_s24 = sphi %s4097_s24, %s4749_s24   ;;  %s4006_s23 = sphi %s4095_s23, %s4751_s23   ;;  %s4002_s22 = sphi %s4093_s22, %s4753_s22   ;;  %s3998_s21 = sphi %s4091_s21, %s4752_s21  }
   0xe   : > { %s4113_s26 = sadd.s32 1, %s4010_s24   ;;  %s99_s28 = sadd.s32 1, %s4006_s23 }
   0xf   : > { %4725 = sst [smem:[#allocation15_spill]] %s4113_s26  ;;  %s96_s27 = ssub.s32 %s4010_s24, %s4113_s26 }
  0x10   : > { %p97_p0 = scmp.eq.s32.totalorder %s96_s27, 0  ;;  %p106_p1 = scmp.ne.s32.totalorder %s4006_s23, %s4002_s22 }
  0x11   : > { %p107_p2 = scmp.eq.s32.totalorder %s4010_s24, 0  ;;  %p112_p3 = scmp.ne.s32.totalorder %s4002_s22, %s3998_s21 }
  0x12   : > { %s4123_s29 = scalar_select %p97_p0, %s4006_s23, %s99_s28  }
  0x13   : > { %p4125_p4 = por %p107_p2, %p106_p1  ;;  %p4703_p5 = scmp.eq.s32.totalorder %s4110_s25, 0 }
  0x14   : > { %4726 = sst [smem:[#allocation16_spill]] %s4123_s29  ;;  %p3047_p6 = scmp.ge.s32.totalorder %s4010_s24, 1 }
  0x15   : > { %p337_p7 = scmp.lt.s32.totalorder %s4010_s24, 3  ;;  %p4134_p8 = por %p4703_p5, %p112_p3 }
  0x16   : > { %s4012_s15 = smov [#allocation8]   ;;  %p3522_p13 = scmp.lt.s32.totalorder %s4010_s24, 2 }
  0x17   : > { %s4728_s13 = scalar_select %p4134_p8, 1, 0 }
  0x18   : > { %p4139_p10 = pnand %p3047_p6, %p337_p7  ;;  %s358_s16 = sshll.u32 %s4012_s15, 4  ;;  %s359_s16 = int_to_ptr.vmem [resolvable:$true] %s358_s16 }
  0x19   : > { %s4153_s18 = sand.u32 1, %s4006_s23   ;;  %s424_s19 = sand.u32 1, %s4010_s24  }
  0x1a   : > { %s4729_s14 = scalar_select %p4139_p10, 1, 0 }
  0x1b   : > { %p3503_p11 = pneg %p4139_p10  ;;  %p4158_p0 = pnand %p3522_p13, %p4125_p4 }
  0x1c   : > { %s3843_s21 = scalar_lea.vmem %s359_s16, 1024  ;;  %p3851_p7 = scmp.lt.s32.totalorder %s359_s16, %s359_s16 }
  0x1d   : > { %p4147_p12 = pnand %p3503_p11, %p4703_p5  ;;  %p3844_p2 = scmp.ne.s32.totalorder %s359_s16, %s3843_s21 }
  0x1e   : > { %p3852_p11 = scmp.lt.s32.totalorder %s3843_s21, %s3843_s21 }
  0x1f   : > { %s4730_s17 = scalar_select %p4147_p12, 1, 0 }
  0x20   : > { %p4713_p1 = pneg %p4147_p12  ;;  %p3853_p9 = por %p3852_p11, %p3851_p7 }
  0x22   : > { %p3846_p3 = pnand %p3844_p2, %p4713_p1 }
  0x24   : > { %p3847_p6 = pneg %p3846_p3 }
  0x26   : > { %p3854_p5 = pnand %p3853_p9, %p3847_p6 }
  0x28   : > { %3857 = shalt.err (!%p3854_p5)
}
  0x29   : > { %s4013_s27 = smov 64   ;;  %s4014_s28 = smov 4  }
  0x2a   : > { %s4732_s9 = sld [smem:[#allocation20_spill]]  ;;  %s4712_s21 = sshll.u32 %s4153_s18, 6 }
  0x2b   : > { %s4711_s29 = sshll.u32 %s4010_s24, 10  ;;  %s4733_s6 = sld [smem:[#allocation19_spill]] }
  0x2c   : > { %s428_s11 = scalar_lea.vmem [#allocation5], %s4712_s21  ;;  %s4188_s2 = scalar_lea.sflag [#allocation6], %s424_s19 }
  0x2d   : > { %s435_s1 = sshll.u32 %s428_s11, 4  ;;  %p4194_p5 = pneg %p4158_p0  ;;  %s4186_s1 = int_to_ptr.vmem [resolvable:$true] %s435_s1 }
  0x30   : > { %3506 = dma.hbm_to_vmem [thread:$0]  (!%p4147_p12), %s4732_s9, 1024, %s359_s16, [#allocation9], %s4013_s27, %s4013_s27, %s4014_s28  }
  0x31   : > { %s4182_s12 = scalar_lea.hbm %s4733_s6, %s4711_s29  ;;  %s3863_s15 = scalar_lea.hbm %s4733_s6, 2048 }
  0x32   : > { %s3858_s30 = scalar_lea.hbm %s4182_s12, 1024  ;;  %p3864_p2 = scmp.lt.s32.totalorder %s4182_s12, %s4733_s6 }
  0x33   : > { %p3859_p4 = scmp.ne.s32.totalorder %s4182_s12, %s3858_s30  ;;  %p3865_p3 = scmp.lt.s32.totalorder %s3863_s15, %s3858_s30 }
  0x35   : > { %p3861_p9 = pnand %p4194_p5, %p3859_p4  ;;  %p3866_p6 = por %p3865_p3, %p3864_p2 }
  0x37   : > { %p3862_p13 = pneg %p3861_p9 }
  0x39   : > { %p3867_p7 = pnand %p3866_p6, %p3862_p13 }
  0x3b   : > { %3870 = shalt.err (!%p3867_p7)
}
  0x3c   : > { %s3871_s19 = scalar_lea.vmem %s4186_s1, 1024  ;;  %s4015_s21 = smov [#allocation5]  }
  0x3d   : > { %p3872_p11 = scmp.ne.s32.totalorder %s4186_s1, %s3871_s19  ;;  %s3876_s23 = sshll.u32 %s4015_s21, 4  ;;  %s3877_s23 = int_to_ptr.vmem [resolvable:$false] %s3876_s23 }
  0x3e   : > { %s3878_s26 = scalar_lea.vmem %s3877_s23, 2048  ;;  %p3879_p1 = scmp.lt.s32.totalorder %s4186_s1, %s3877_s23 }
  0x3f   : > { %p3874_p4 = pnand %p3872_p11, %p4194_p5  ;;  %p3880_p8 = scmp.lt.s32.totalorder %s3878_s26, %s3871_s19 }
  0x41   : > { %p3875_p9 = pneg %p3874_p4  ;;  %p3881_p10 = por %p3880_p8, %p3879_p1 }
  0x43   : > { %p3882_p12 = pnand %p3881_p10, %p3875_p9 }
  0x45   : > { %3885 = shalt.err (!%p3882_p12)
}
  0x46   : > { %3516 = dma.hbm_to_vmem [thread:$0]  (!%p4158_p0), %s4182_s12, 1024, %s4186_s1, %s4188_s2, %s4013_s27, %s4013_s27, %s4014_s28  }
  0x47   : > { %s4735_s29 = sshll.u32 %s4153_s18, 6  ;;  %s4736_s15 = sshll.u32 %s4010_s24, 10 }
  0x48   : > { %s449_s21 = scalar_lea.vmem [#allocation7], %s4735_s29  ;;  %s4227_s23 = scalar_lea.hbm %s4697_s7, %s4736_s15 }
  0x49   : > { %s456_s30 = sshll.u32 %s449_s21, 4  ;;  %s4016_s26 = smov [#allocation10]   ;;  %s4229_s30 = int_to_ptr.vmem [resolvable:$true] %s456_s30 }
  0x4a   : > { %s371_s6 = sshll.u32 %s4016_s26, 4  ;;  %p4737_p10 = scmp.ne.s32.totalorder %s4730_s17, 0  ;;  %s372_s6 = int_to_ptr.vmem [resolvable:$true] %s371_s6 }
  0x4b   : > { %s3897_s9 = scalar_lea.vmem %s372_s6, 1024  ;;  %p3905_p2 = scmp.lt.s32.totalorder %s372_s6, %s372_s6 }
  0x4c   : > { %p3898_p8 = scmp.ne.s32.totalorder %s372_s6, %s3897_s9  ;;  %p4738_p12 = pneg %p4737_p10 }
  0x4d   : > { %p3906_p3 = scmp.lt.s32.totalorder %s3897_s9, %s3897_s9 }
  0x4e   : > { %p3900_p1 = pnand %p3898_p8, %p4738_p12 }
  0x4f   : > { %p3907_p6 = por %p3906_p3, %p3905_p2 }
  0x50   : > { %p3901_p13 = pneg %p3900_p1 }
  0x52   : > { %p3908_p7 = pnand %p3907_p6, %p3901_p13 }
  0x54   : > { %3911 = shalt.err (!%p3908_p7)
}
  0x55   : > { %3509 = dma.hbm_to_vmem [thread:$0]  (!%p4737_p10), %s4700_s10, 1024, %s372_s6, [#allocation9], %s4013_s27, %s4013_s27, %s4014_s28  }
  0x56   : > { %s3485_s29 = smul.u32 768, %s4153_s18  ;;  %s389_s26 = scalar_lea.sflag [#allocation4], %s4153_s18 }
  0x57   : > { %s3486_s21 = smul.u32 12288, %s4010_s24  ;;  %s3917_s12 = scalar_lea.hbm %s4693_s3, 24576 }
  0x58   : > { %s392_s17 = scalar_lea.vmem [#allocation3], %s3485_s29 }
  0x59   : > { %s4247_s11 = scalar_lea.hbm %s4693_s3, %s3486_s21  ;;  %s399_s19 = sshll.u32 %s392_s17, 4  ;;  %s4249_s19 = int_to_ptr.vmem [resolvable:$true] %s399_s19 }
  0x5a   : > { %s3912_s1 = scalar_lea.hbm %s4247_s11, 12288  ;;  %p3918_p8 = scmp.lt.s32.totalorder %s4247_s11, %s4693_s3 }
  0x5b   : > { %p3913_p11 = scmp.ne.s32.totalorder %s4247_s11, %s3912_s1  ;;  %p3919_p10 = scmp.lt.s32.totalorder %s3917_s12, %s3912_s1 }
  0x5d   : > { %p3915_p4 = pnand %p3913_p11, %p4194_p5  ;;  %p3920_p12 = por %p3919_p10, %p3918_p8 }
  0x5f   : > { %p3916_p9 = pneg %p3915_p4 }
  0x61   : > { %p3921_p1 = pnand %p3920_p12, %p3916_p9 }
  0x63   : > { %3924 = shalt.err (!%p3921_p1)
}
  0x64   : > { %s3925_s29 = scalar_lea.vmem %s4249_s19, 12288  ;;  %s4017_s9 = smov [#allocation3]  }
  0x65   : > { %p3926_p13 = scmp.ne.s32.totalorder %s4249_s19, %s3925_s29  ;;  %s3930_s17 = sshll.u32 %s4017_s9, 4  ;;  %s3931_s17 = int_to_ptr.vmem [resolvable:$false] %s3930_s17 }
  0x66   : > { %s3932_s6 = scalar_lea.vmem %s3931_s17, 24576  ;;  %p3933_p6 = scmp.lt.s32.totalorder %s4249_s19, %s3931_s17 }
  0x67   : > { %p3928_p2 = pnand %p3926_p13, %p4194_p5  ;;  %p3934_p7 = scmp.lt.s32.totalorder %s3932_s6, %s3925_s29 }
  0x69   : > { %p3929_p3 = pneg %p3928_p2  ;;  %p3935_p11 = por %p3934_p7, %p3933_p6 }
  0x6b   : > { %p3936_p4 = pnand %p3935_p11, %p3929_p3 }
  0x6d   : > { %3939 = shalt.err (!%p3936_p4)
}
  0x6e   : > { %s4018_s1 = smov 768   ;;  %s4019_s24 = smov 48  }
  0x6f   : > { %3513 = dma.hbm_to_vmem [thread:$0]  (!%p4158_p0), %s4247_s11, 12288, %s4249_s19, %s389_s26, %s4018_s1, %s4018_s1, %s4019_s24  }
  0x70   : > { %s3940_s12 = scalar_lea.hbm %s4227_s23, 1024  ;;  %s3945_s29 = scalar_lea.hbm %s4697_s7, 2048 }
  0x71   : > { %p3941_p9 = scmp.ne.s32.totalorder %s4227_s23, %s3940_s12  ;;  %p3946_p12 = scmp.lt.s32.totalorder %s4227_s23, %s4697_s7 }
  0x72   : > { %p3947_p1 = scmp.lt.s32.totalorder %s3945_s29, %s3940_s12 }
  0x73   : > { %p3943_p8 = pnand %p3941_p9, %p4194_p5 }
  0x74   : > { %p3948_p13 = por %p3947_p1, %p3946_p12 }
  0x75   : > { %p3944_p10 = pneg %p3943_p8 }
  0x77   : > { %p3949_p2 = pnand %p3948_p13, %p3944_p10 }
  0x79   : > { %3952 = shalt.err (!%p3949_p2)
}
  0x7a   : > { %s3953_s18 = scalar_lea.vmem %s4229_s30, 1024  ;;  %s4020_s11 = smov [#allocation7]  }
  0x7b   : > { %p3954_p3 = scmp.ne.s32.totalorder %s4229_s30, %s3953_s18  ;;  %s3958_s19 = sshll.u32 %s4020_s11, 4  ;;  %s3959_s19 = int_to_ptr.vmem [resolvable:$false] %s3958_s19 }
  0x7c   : > { %s3960_s26 = scalar_lea.vmem %s3959_s19, 2048  ;;  %p3961_p11 = scmp.lt.s32.totalorder %s4229_s30, %s3959_s19 }
  0x7d   : > { %p3956_p6 = pnand %p3954_p3, %p4194_p5  ;;  %p3962_p4 = scmp.lt.s32.totalorder %s3960_s26, %s3953_s18 }
  0x7f   : > { %p3957_p7 = pneg %p3956_p6  ;;  %p3963_p9 = por %p3962_p4, %p3961_p11 }
  0x81   : > { %p3964_p8 = pnand %p3963_p9, %p3957_p7 }
  0x83   : > { %3967 = shalt.err (!%p3964_p8)
}
  0x84   : > { %3519 = dma.hbm_to_vmem [thread:$0]  (!%p4158_p0), %s4227_s23, 1024, %s4229_s30, %s4188_s2, %s4013_s27, %s4013_s27, %s4014_s28  }
  0x85   : > { %p4739_p5 = scmp.ne.s32.totalorder %s4729_s14, 0 }
  0x86   : > { %s477_s16 = sand.u32 (!%p4739_p5), 1, %s4002_s22   ;;  %p4740_p10 = scmp.ne.s32.totalorder (!%p4739_p5), %s4728_s13, 0 }
  0x87   : > { %475 = sbr.rel (%p4739_p5) target bundleno = 2778 (0xada), region = 68  ;;  %s478_s1 = scalar_lea.sflag (!%p4739_p5), [#allocation4], %s477_s16 }
  0x88   : > { %s3487_s6 = smul.u32 (!%p4739_p5), 768, %s477_s16 }
  0x8a   : > { %s4301_s24 = scalar_lea.vmem (!%p4739_p5), [#allocation3], %s3487_s6 }
  0x8c   : > { %3985 = dma.done.wait (%p4740_p10), %s478_s1, 12288  }
  0x8d   : > { %3987 = vsyncadd (%p4740_p10), %s478_s1, 4294955008  ;;  %s486_s20 = sand.u32 1, %s4110_s25   ;;  %s3059_s12 = sshll.u32 %s477_s16, 6 }
  0x8e   : > { %s487_s2 = scalar_lea.sflag [#allocation6], %s486_s20  ;;  %s4308_s27 = scalar_lea.vmem [#allocation5], %s3059_s12 }
  0x8f   : > { %3989 = dma.done.wait (%p4740_p10), %s487_s2, 2048  }
  0x90   : > { %3991 = vsyncadd (%p4740_p10), %s487_s2, 4294965248  ;;  %s4314_s14 = scalar_lea.vmem [#allocation7], %s3059_s12  ;;  %p4741_p0 = scmp.eq.s32.totalorder %s4110_s25, 0 }
  0x92   : > { %3993 = dma.done.wait (%p4741_p0), [#allocation9], 2048   ;;  %p4742_p12 = pmov %p4741_p0 }
  0x93   : > { %p566_p1 = scmp.lt.s32.totalorder %s4110_s25, 1  ;;  %p4743_p13 = scmp.ne.s32.totalorder %s4110_s25, 0 }
  0x94   : > { %3995 = vsyncadd (%p4742_p12), [#allocation9], 4294965248 }
  0x95   : > { %s567_s28 = scalar_select %p566_p1, %s4110_s25, 1 }
  0x96   : > { %583 = sbr.rel (%p4743_p13) target bundleno = 331 (0x14b), region = 92 }
  0x97   : > { %s3488_s30 = smul.u32 12, %s567_s28  ;;  %s3246_s23 = sshll.u32 %s567_s28, 8 }
  0x98   : > { %s4325_s29 = scalar_lea.vmem %s4695_s5, %s3246_s23  ;;  %s3065_s13 = sshll.u32 %s567_s28, 3 }
  0x99   : > { %s4330_s18 = scalar_lea.vmem %s4694_s4, %s3488_s30  ;;  %s4335_s26 = scalar_lea.vmem %s4698_s8, %s3065_s13 }
  0x9a   : > { %s4744_s28 = sld [smem:[#allocation18_spill]] (!%p4743_p13) }
  0x9b   : > { %v584_v0 = vld [vmem:[%s4690_s0] sm:$0xff]  ;;  %v585_v1 = vld [vmem:[%s4690_s0 + $0x8] sm:$0xff] }
  0x9c   : > { %588 = vadd.xlane.f32.xlu0 %v584_v0  ;;  %v594_v2 = vmul.f32 %v584_v0, %v584_v0  ;;  %v595_v3 = vmul.f32 %v585_v1, %v585_v1 }
  0x9e   : > { %596 = vadd.xlane.f32.xlu1 %v594_v2 }
  0xa0   : > { %590 = vadd.xlane.f32.xlu0 %v585_v1  ;;  %v3067_v23 = vld [vmem:[%s4744_s28] ss:$0 sm:$0xff]  ;;  %v3068_v28 = vld [vmem:[%s4744_s28 + $0x1] ss:$0 sm:$0xff] }
  0xa2   : > { %598 = vadd.xlane.f32.xlu1 %v595_v3 }
 0x125   : > { %v589_v4 = vpop.xlane.xlu0 %588 }
 0x126   : > { %v592_v5 = vmul.f32 0.03125, %v589_v4 }
 0x127   : > { %v597_v6 = vpop.xlane.xlu1 %596 }
 0x128   : > { %v602_v7 = vmul.f32 %v592_v5, %v592_v5  ;;  %v600_v8 = vmul.f32 0.03125, %v597_v6  ;;  %v608_v20 = vsub.f32 %v584_v0, %v592_v5 }
 0x129   : > { %v591_v9 = vpop.xlane.xlu0 %590 }
 0x12a   : > { %v604_v10 = vsub.f32 %v600_v8, %v602_v7  ;;  %v593_v11 = vmul.f32 0.03125, %v591_v9 }
 0x12b   : > { %v599_v12 = vpop.xlane.xlu1 %598 }
 0x12c   : > { %v606_v13 = vmax.f32 %v604_v10, 0.0  ;;  %v603_v14 = vmul.f32 %v593_v11, %v593_v11  ;;  %v601_v15 = vmul.f32 0.03125, %v599_v12  ;;  %v609_v24 = vsub.f32 %v585_v1, %v593_v11 }
 0x12e   : > { %v610_v16 = vadd.f32 1e-12, %v606_v13  ;;  %v605_v17 = vsub.f32 %v601_v15, %v603_v14 }
 0x130   : > { %3568 = vrsqrt.f32 %v610_v16  ;;  %v607_v18 = vmax.f32 %v605_v17, 0.0 }
 0x132   : > { %v611_v19 = vadd.f32 1e-12, %v607_v18 }
 0x134   : > { %3570 = vrsqrt.f32 %v611_v19 }
 0x13d   : > { %v3569_v21 = vpop.eup %3568 }
 0x13e   : > { %v614_v22 = vmul.f32 %v3569_v21, %v608_v20 }
 0x140   : > { %v620_v26 = vmul.f32 %v3067_v23, %v614_v22 }
 0x141   : > { %v3571_v25 = vpop.eup %3570 }
 0x142   : > { %v615_v27 = vmul.f32 %v3571_v25, %v609_v24  ;;  %v626_v30 = vadd.f32 %v3068_v28, %v620_v26 }
 0x144   : > { %v621_v29 = vmul.f32 %v3067_v23, %v615_v27 }
 0x146   : > { %v627_v31 = vadd.f32 %v3068_v28, %v621_v29 }
 0x148   : > { %v3254_v32 = vpack.c.bf16 %v627_v31, %v626_v30 }
 0x14a   : > { %3255 = vst [vmem:[#allocation2] sm:$0xff] %v3254_v32  }
 0x14b PF: > { %v3572_v33 = vld [vmem:[%s4301_s24 + $0x2a4] ss:$48 sps:$4 sm:$0xff]   ;;  %v3574_v34 = vld [vmem:[%s4301_s24 + $0x2ac] ss:$48 sps:$4 sm:$0xff]   ;;  %v4021_v35 = vmov 0   ;;  %vm4023_vm0 = vmmov 0  }
 0x14c   : > { %1321 = vmatprep.mubr.bf16.mxu0 %v4021_v35  ;;  %1364 = vmatprep.mubr.bf16.mxu1 %v4021_v35  ;;  %v3576_v36 = vld [vmem:[%s4301_s24 + $0x2a0] ss:$48 sps:$4 sm:$0xff]   ;;  %v3577_v37 = vld [vmem:[%s4301_s24 + $0x2a8] ss:$48 sps:$4 sm:$0xff]   ;;  %v3578_v38 = vld [vmem:[%s4301_s24 + $0x244] ss:$48 sps:$4 sm:$0xff]  }
 0x14d   : > { %1289 = vmatprep.subr.bf16.mxu0 %v3572_v33  ;;  %1332 = vmatprep.subr.bf16.mxu1 %v3574_v34  ;;  %v3580_v39 = vld [vmem:[%s4301_s24 + $0x24c] ss:$48 sps:$4 sm:$0xff]   ;;  %v3582_v40 = vld [vmem:[%s4301_s24 + $0x240] ss:$48 sps:$4 sm:$0xff]   ;;  %v3583_v41 = vld [vmem:[%s4301_s24 + $0x248] ss:$48 sps:$4 sm:$0xff]  }
 0x14e   : > { %1290 = vmatpush1.bf16.msra.mxu0 %v3576_v36  ;;  %1333 = vmatpush1.bf16.msra.mxu1 %v3577_v37  ;;  %v3584_v42 = vld [vmem:[%s4301_s24 + $0x1e4] ss:$48 sps:$4 sm:$0xff]   ;;  %v3586_v43 = vld [vmem:[%s4301_s24 + $0x1ec] ss:$48 sps:$4 sm:$0xff]   ;;  %v3588_v44 = vld [vmem:[%s4301_s24 + $0x1e0] ss:$48 sps:$4 sm:$0xff]  }
 0x14f   : > { %1291 = vmatprep.subr.bf16.mxu0 %v3578_v38  ;;  %1334 = vmatprep.subr.bf16.mxu1 %v3580_v39  ;;  %v3589_v45 = vld [vmem:[%s4301_s24 + $0x1e8] ss:$48 sps:$4 sm:$0xff]   ;;  %v3590_v46 = vld [vmem:[%s4301_s24 + $0x184] ss:$48 sps:$4 sm:$0xff]   ;;  %v3592_v47 = vld [vmem:[%s4301_s24 + $0x18c] ss:$48 sps:$4 sm:$0xff]  }
 0x150   : > { %v3594_v48 = vld [vmem:[%s4301_s24 + $0x180] ss:$48 sps:$4 sm:$0xff]   ;;  %v3595_v49 = vld [vmem:[%s4301_s24 + $0x188] ss:$48 sps:$4 sm:$0xff]   ;;  %v3596_v50 = vld [vmem:[%s4301_s24 + $0x124] ss:$48 sps:$4 sm:$0xff]  }
 0x151   : > { %v3598_v51 = vld [vmem:[%s4301_s24 + $0x12c] ss:$48 sps:$4 sm:$0xff]   ;;  %v3600_v52 = vld [vmem:[%s4301_s24 + $0x120] ss:$48 sps:$4 sm:$0xff]   ;;  %v3601_v53 = vld [vmem:[%s4301_s24 + $0x128] ss:$48 sps:$4 sm:$0xff]  }
 0x152   : > { %1292 = vmatpush1.bf16.msra.mxu0 %v3582_v40  ;;  %1335 = vmatpush1.bf16.msra.mxu1 %v3583_v41  ;;  %v3602_v54 = vld [vmem:[%s4301_s24 + $0xc4] ss:$48 sps:$4 sm:$0xff]   ;;  %v3604_v55 = vld [vmem:[%s4301_s24 + $0xcc] ss:$48 sps:$4 sm:$0xff]   ;;  %v3606_v56 = vld [vmem:[%s4301_s24 + $0xc0] ss:$48 sps:$4 sm:$0xff]  }
 0x153   : > { %1293 = vmatprep.subr.bf16.mxu0 %v3584_v42  ;;  %1336 = vmatprep.subr.bf16.mxu1 %v3586_v43  ;;  %v3607_v57 = vld [vmem:[%s4301_s24 + $0xc8] ss:$48 sps:$4 sm:$0xff]   ;;  %v3608_v58 = vld [vmem:[%s4301_s24 + $0x64] ss:$48 sps:$4 sm:$0xff]   ;;  %v3610_v59 = vld [vmem:[%s4301_s24 + $0x6c] ss:$48 sps:$4 sm:$0xff]  }
 0x154   : > { %v3612_v60 = vld [vmem:[%s4301_s24 + $0x60] ss:$48 sps:$4 sm:$0xff]   ;;  %v3613_v61 = vld [vmem:[%s4301_s24 + $0x68] ss:$48 sps:$4 sm:$0xff]   ;;  %v3614_v62 = vld [vmem:[%s4301_s24 + $0x4] ss:$48 sps:$4 sm:$0xff]  }
 0x155   : > { %v3616_v63 = vld [vmem:[%s4301_s24 + $0xc] ss:$48 sps:$4 sm:$0xff]   ;;  %v3618_v0 = vld [vmem:[%s4301_s24] ss:$48 sps:$4 sm:$0xff]   ;;  %v3619_v1 = vld [vmem:[%s4301_s24 + $0x8] ss:$48 sps:$4 sm:$0xff]  }
 0x156   : > { %1294 = vmatpush1.bf16.msra.mxu0 %v3588_v44  ;;  %1337 = vmatpush1.bf16.msra.mxu1 %v3589_v45  ;;  %v4385_v2 = vld [vmem:[#allocation2] sm:$0xff]   ;;  %v3623_v3 = vld [vmem:[%s4301_s24 + $0x2b4] ss:$48 sps:$4 sm:$0xff]   ;;  %v3621_v5 = vld [vmem:[%s4301_s24 + $0x2b0] ss:$48 sps:$4 sm:$0xff]   ;;  %s4745_s21 = sld [smem:[#allocation17_spill]] }
 0x157   : > { %1295 = vmatprep.subr.bf16.mxu0 %v3590_v46  ;;  %1338 = vmatprep.subr.bf16.mxu1 %v3592_v47  ;;  %v3626_v4 = vld [vmem:[%s4301_s24 + $0x2bc] ss:$48 sps:$4 sm:$0xff]   ;;  %v3624_v6 = vld [vmem:[%s4301_s24 + $0x2b8] ss:$48 sps:$4 sm:$0xff]   ;;  %v3629_v7 = vld [vmem:[%s4301_s24 + $0x254] ss:$48 sps:$4 sm:$0xff]  }
 0x158   : > { %v3632_v8 = vld [vmem:[%s4301_s24 + $0x25c] ss:$48 sps:$4 sm:$0xff]   ;;  %v3627_v9 = vld [vmem:[%s4301_s24 + $0x250] ss:$48 sps:$4 sm:$0xff]   ;;  %v3630_v10 = vld [vmem:[%s4301_s24 + $0x258] ss:$48 sps:$4 sm:$0xff]  }
 0x159   : > { %v3635_v11 = vld [vmem:[%s4301_s24 + $0x1f4] ss:$48 sps:$4 sm:$0xff]   ;;  %v3638_v12 = vld [vmem:[%s4301_s24 + $0x1fc] ss:$48 sps:$4 sm:$0xff]   ;;  %v3633_v13 = vld [vmem:[%s4301_s24 + $0x1f0] ss:$48 sps:$4 sm:$0xff]  }
 0x15a   : > { %1296 = vmatpush1.bf16.msra.mxu0 %v3594_v48  ;;  %1339 = vmatpush1.bf16.msra.mxu1 %v3595_v49  ;;  %v3636_v14 = vld [vmem:[%s4301_s24 + $0x1f8] ss:$48 sps:$4 sm:$0xff]   ;;  %v3641_v15 = vld [vmem:[%s4301_s24 + $0x194] ss:$48 sps:$4 sm:$0xff]   ;;  %v3644_v16 = vld [vmem:[%s4301_s24 + $0x19c] ss:$48 sps:$4 sm:$0xff]  }
 0x15b   : > { %1297 = vmatprep.subr.bf16.mxu0 %v3596_v50  ;;  %1340 = vmatprep.subr.bf16.mxu1 %v3598_v51  ;;  %v3639_v17 = vld [vmem:[%s4301_s24 + $0x190] ss:$48 sps:$4 sm:$0xff]   ;;  %v3642_v18 = vld [vmem:[%s4301_s24 + $0x198] ss:$48 sps:$4 sm:$0xff]   ;;  %v3647_v19 = vld [vmem:[%s4301_s24 + $0x134] ss:$48 sps:$4 sm:$0xff]  }
 0x15c   : > { %v3650_v20 = vld [vmem:[%s4301_s24 + $0x13c] ss:$48 sps:$4 sm:$0xff]   ;;  %v3645_v21 = vld [vmem:[%s4301_s24 + $0x130] ss:$48 sps:$4 sm:$0xff]   ;;  %v3648_v22 = vld [vmem:[%s4301_s24 + $0x138] ss:$48 sps:$4 sm:$0xff]   ;;  %s4746_s13 = smov %s4745_s21 }
 0x15d   : > { %v3653_v23 = vld [vmem:[%s4301_s24 + $0xd4] ss:$48 sps:$4 sm:$0xff]   ;;  %v3656_v24 = vld [vmem:[%s4301_s24 + $0xdc] ss:$48 sps:$4 sm:$0xff]   ;;  %v3651_v25 = vld [vmem:[%s4301_s24 + $0xd0] ss:$48 sps:$4 sm:$0xff]  }
 0x15e   : > { %1298 = vmatpush1.bf16.msra.mxu0 %v3600_v52  ;;  %1341 = vmatpush1.bf16.msra.mxu1 %v3601_v53  ;;  %v3654_v26 = vld [vmem:[%s4301_s24 + $0xd8] ss:$48 sps:$4 sm:$0xff]   ;;  %v3659_v27 = vld [vmem:[%s4301_s24 + $0x74] ss:$48 sps:$4 sm:$0xff]   ;;  %v3662_v28 = vld [vmem:[%s4301_s24 + $0x7c] ss:$48 sps:$4 sm:$0xff]  }
 0x15f   : > { %1299 = vmatprep.subr.bf16.mxu0 %v3602_v54  ;;  %1342 = vmatprep.subr.bf16.mxu1 %v3604_v55  ;;  %v3657_v29 = vld [vmem:[%s4301_s24 + $0x70] ss:$48 sps:$4 sm:$0xff]   ;;  %v3660_v30 = vld [vmem:[%s4301_s24 + $0x78] ss:$48 sps:$4 sm:$0xff]   ;;  %v3665_v31 = vld [vmem:[%s4301_s24 + $0x14] ss:$48 sps:$4 sm:$0xff]  }
 0x160   : > { %v3668_v32 = vld [vmem:[%s4301_s24 + $0x1c] ss:$48 sps:$4 sm:$0xff]   ;;  %v3663_v33 = vld [vmem:[%s4301_s24 + $0x10] ss:$48 sps:$4 sm:$0xff]   ;;  %v3666_v34 = vld [vmem:[%s4301_s24 + $0x18] ss:$48 sps:$4 sm:$0xff]  }
 0x161   : > { %v3671_v36 = vld [vmem:[%s4301_s24 + $0x2c4] ss:$48 sps:$4 sm:$0xff]   ;;  %v3674_v37 = vld [vmem:[%s4301_s24 + $0x2cc] ss:$48 sps:$4 sm:$0xff]   ;;  %v3669_v38 = vld [vmem:[%s4301_s24 + $0x2c0] ss:$48 sps:$4 sm:$0xff]  }
 0x162   : > { %1300 = vmatpush1.bf16.msra.mxu0 %v3606_v56  ;;  %1343 = vmatpush1.bf16.msra.mxu1 %v3607_v57  ;;  %v3672_v39 = vld [vmem:[%s4301_s24 + $0x2c8] ss:$48 sps:$4 sm:$0xff]   ;;  %v3677_v40 = vld [vmem:[%s4301_s24 + $0x264] ss:$48 sps:$4 sm:$0xff]   ;;  %v3680_v41 = vld [vmem:[%s4301_s24 + $0x26c] ss:$48 sps:$4 sm:$0xff]  }
 0x163   : > { %1301 = vmatprep.subr.bf16.mxu0 %v3608_v58  ;;  %1344 = vmatprep.subr.bf16.mxu1 %v3610_v59  ;;  %v3675_v42 = vld [vmem:[%s4301_s24 + $0x260] ss:$48 sps:$4 sm:$0xff]   ;;  %v3678_v43 = vld [vmem:[%s4301_s24 + $0x268] ss:$48 sps:$4 sm:$0xff]   ;;  %v3683_v44 = vld [vmem:[%s4301_s24 + $0x204] ss:$48 sps:$4 sm:$0xff]  }
 0x164   : > { %v3686_v45 = vld [vmem:[%s4301_s24 + $0x20c] ss:$48 sps:$4 sm:$0xff]   ;;  %v3681_v46 = vld [vmem:[%s4301_s24 + $0x200] ss:$48 sps:$4 sm:$0xff]   ;;  %v3684_v47 = vld [vmem:[%s4301_s24 + $0x208] ss:$48 sps:$4 sm:$0xff]  }
 0x165   : > { %v3689_v48 = vld [vmem:[%s4301_s24 + $0x1a4] ss:$48 sps:$4 sm:$0xff]   ;;  %v3692_v49 = vld [vmem:[%s4301_s24 + $0x1ac] ss:$48 sps:$4 sm:$0xff]   ;;  %v3687_v50 = vld [vmem:[%s4301_s24 + $0x1a0] ss:$48 sps:$4 sm:$0xff]  }
 0x166   : > { %1302 = vmatpush1.bf16.msra.mxu0 %v3612_v60  ;;  %1345 = vmatpush1.bf16.msra.mxu1 %v3613_v61  ;;  %v3690_v51 = vld [vmem:[%s4301_s24 + $0x1a8] ss:$48 sps:$4 sm:$0xff]   ;;  %v3695_v52 = vld [vmem:[%s4301_s24 + $0x144] ss:$48 sps:$4 sm:$0xff]   ;;  %v3698_v53 = vld [vmem:[%s4301_s24 + $0x14c] ss:$48 sps:$4 sm:$0xff]  }
 0x167   : > { %1303 = vmatprep.subr.bf16.mxu0 %v3614_v62  ;;  %1346 = vmatprep.subr.bf16.mxu1 %v3616_v63  ;;  %v3696_v54 = vld [vmem:[%s4301_s24 + $0x148] ss:$48 sps:$4 sm:$0xff]   ;;  %v3701_v55 = vld [vmem:[%s4301_s24 + $0xe4] ss:$48 sps:$4 sm:$0xff]   ;;  %v3704_v56 = vld [vmem:[%s4301_s24 + $0xec] ss:$48 sps:$4 sm:$0xff]  }
 0x168   : > { %v3699_v57 = vld [vmem:[%s4301_s24 + $0xe0] ss:$48 sps:$4 sm:$0xff]   ;;  %v3702_v58 = vld [vmem:[%s4301_s24 + $0xe8] ss:$48 sps:$4 sm:$0xff]   ;;  %v3707_v59 = vld [vmem:[%s4301_s24 + $0x84] ss:$48 sps:$4 sm:$0xff]  }
 0x169   : > { %v3710_v60 = vld [vmem:[%s4301_s24 + $0x8c] ss:$48 sps:$4 sm:$0xff]   ;;  %v3705_v61 = vld [vmem:[%s4301_s24 + $0x80] ss:$48 sps:$4 sm:$0xff]   ;;  %v3708_v62 = vld [vmem:[%s4301_s24 + $0x88] ss:$48 sps:$4 sm:$0xff]  }
 0x16a   : > { %1304 = vmatpush1.bf16.msra.mxu0 %v3618_v0  ;;  %1347 = vmatpush1.bf16.msra.mxu1 %v3619_v1  ;;  %v3713_v63 = vld [vmem:[%s4301_s24 + $0x24] ss:$48 sps:$4 sm:$0xff]   ;;  %v3716_v0 = vld [vmem:[%s4301_s24 + $0x2c] ss:$48 sps:$4 sm:$0xff]   ;;  %v3711_v1 = vld [vmem:[%s4301_s24 + $0x20] ss:$48 sps:$4 sm:$0xff]  }
 0x16b   : > { %1375 = vmatprep.subr.bf16.mxu0 %v3623_v3  ;;  %1418 = vmatprep.subr.bf16.mxu1 %v3626_v4  ;;  %v3714_v3 = vld [vmem:[%s4301_s24 + $0x28] ss:$48 sps:$4 sm:$0xff]   ;;  %v4022_v4 = vmov 0.0   ;;  %vm1593_vm1 = vcmask 130048   ;;  %p3222_p2 = scmp.ne.s32.totalorder %s4110_s25, 1 }
 0x16d   : > { %1322 = vmatmul.mubr.bf16.vlgmr.msra.gmra.mxu0 %v4385_v2  ;;  %1365 = vmatmul.mubr.bf16.vlgmr.msra.gmra.mxu1 %v4385_v2 }
 0x16e   : > { %1376 = vmatpush1.bf16.msra.mxu0 %v3621_v5  ;;  %1419 = vmatpush1.bf16.msra.mxu1 %v3624_v6  ;;  %v743_v5 = vlaneseq }
 0x16f   : > { %1377 = vmatprep.subr.bf16.mxu0 %v3629_v7  ;;  %1420 = vmatprep.subr.bf16.mxu1 %v3632_v8  ;;  %v739_v8 = vld [vmem:[%s4330_s18] sm:$0xff] }
 0x170   : > { %1407 = vmatprep.mubr.bf16.mxu0 %v4021_v35  ;;  %1450 = vmatprep.mubr.bf16.mxu1 %v4021_v35  ;;  %v4467_v6 = vshrl.u32 %v743_v5, 7 }
 0x172   : > { %1378 = vmatpush1.bf16.msra.mxu0 %v3627_v9  ;;  %1421 = vmatpush1.bf16.msra.mxu1 %v3630_v10  ;;  %v4470_v7 = vsub.s32 2, %v4467_v6 }
 0x173   : > { %1379 = vmatprep.subr.bf16.mxu0 %v3635_v11  ;;  %1422 = vmatprep.subr.bf16.mxu1 %v3638_v12 }
 0x174   : > { %v754_v11 = vrot.slane %v739_v8, %v4470_v7 }
 0x176   : > { %1380 = vmatpush1.bf16.msra.mxu0 %v3633_v13  ;;  %1423 = vmatpush1.bf16.msra.mxu1 %v3636_v14 }
 0x177   : > { %1381 = vmatprep.subr.bf16.mxu0 %v3641_v15  ;;  %1424 = vmatprep.subr.bf16.mxu1 %v3644_v16  ;;  %v4479_v15 = vsub.s32 0, %v4467_v6 }
 0x17a   : > { %1382 = vmatpush1.bf16.msra.mxu0 %v3639_v17  ;;  %1425 = vmatpush1.bf16.msra.mxu1 %v3642_v18 }
 0x17b   : > { %1383 = vmatprep.subr.bf16.mxu0 %v3647_v19  ;;  %1426 = vmatprep.subr.bf16.mxu1 %v3650_v20 }
 0x17e   : > { %1384 = vmatpush1.bf16.msra.mxu0 %v3645_v21  ;;  %1427 = vmatpush1.bf16.msra.mxu1 %v3648_v22 }
 0x17f   : > { %1385 = vmatprep.subr.bf16.mxu0 %v3653_v23  ;;  %1428 = vmatprep.subr.bf16.mxu1 %v3656_v24  ;;  %v746_v24 = vrot.slane %v739_v8, %v4479_v15 }
 0x182   : > { %1386 = vmatpush1.bf16.msra.mxu0 %v3651_v25  ;;  %1429 = vmatpush1.bf16.msra.mxu1 %v3654_v26 }
 0x183   : > { %1387 = vmatprep.subr.bf16.mxu0 %v3659_v27  ;;  %1430 = vmatprep.subr.bf16.mxu1 %v3662_v28 }
 0x186   : > { %1388 = vmatpush1.bf16.msra.mxu0 %v3657_v29  ;;  %1431 = vmatpush1.bf16.msra.mxu1 %v3660_v30  ;;  %v761_v29 = vsub.s32 4, %v4467_v6  ;;  %v765_v30 = vsub.s32 5, %v4467_v6 }
 0x187   : > { %1389 = vmatprep.subr.bf16.mxu0 %v3665_v31  ;;  %1432 = vmatprep.subr.bf16.mxu1 %v3668_v32 }
 0x188   : > { %v762_v32 = vrot.slane %v739_v8, %v761_v29 }
 0x18a   : > { %1390 = vmatpush1.bf16.msra.mxu0 %v3663_v33  ;;  %1433 = vmatpush1.bf16.msra.mxu1 %v3666_v34 }
 0x18b   : > { %1461 = vmatprep.subr.bf16.mxu0 %v3671_v36  ;;  %1504 = vmatprep.subr.bf16.mxu1 %v3674_v37  ;;  %v766_v36 = vrot.slane %v739_v8, %v765_v30 }
 0x18d   : > { %1408 = vmatmul.mubr.bf16.vlgmr.msra.gmra.mxu0 %v4385_v2  ;;  %1451 = vmatmul.mubr.bf16.vlgmr.msra.gmra.mxu1 %v4385_v2 }
 0x18e   : > { %1462 = vmatpush1.bf16.msra.mxu0 %v3669_v38  ;;  %1505 = vmatpush1.bf16.msra.mxu1 %v3672_v39 }
 0x18f   : > { %1463 = vmatprep.subr.bf16.mxu0 %v3677_v40  ;;  %1506 = vmatprep.subr.bf16.mxu1 %v3680_v41  ;;  %v4493_v40 = vsub.s32 3, %v4467_v6 }
 0x190   : > { %1493 = vmatprep.mubr.bf16.mxu0 %v4021_v35  ;;  %1536 = vmatprep.mubr.bf16.mxu1 %v4021_v35  ;;  %v3693_v35 = vld [vmem:[%s4301_s24 + $0x140] ss:$48 sps:$4 sm:$0xff]  }
 0x192   : > { %1464 = vmatpush1.bf16.msra.mxu0 %v3675_v42  ;;  %1507 = vmatpush1.bf16.msra.mxu1 %v3678_v43 }
 0x193   : > { %1465 = vmatprep.subr.bf16.mxu0 %v3683_v44  ;;  %1508 = vmatprep.subr.bf16.mxu1 %v3686_v45  ;;  %v773_v44 = vsub.s32 7, %v4467_v6 }
 0x196   : > { %1466 = vmatpush1.bf16.msra.mxu0 %v3681_v46  ;;  %1509 = vmatpush1.bf16.msra.mxu1 %v3684_v47 }
 0x197   : > { %1467 = vmatprep.subr.bf16.mxu0 %v3689_v48  ;;  %1510 = vmatprep.subr.bf16.mxu1 %v3692_v49  ;;  %v758_v49 = vrot.slane %v739_v8, %v4493_v40 }
 0x19a   : > { %1468 = vmatpush1.bf16.msra.mxu0 %v3687_v50  ;;  %1511 = vmatpush1.bf16.msra.mxu1 %v3690_v51  ;;  %v774_v51 = vrot.slane %v739_v8, %v773_v44 }
 0x19b   : > { %1469 = vmatprep.subr.bf16.mxu0 %v3695_v52  ;;  %1512 = vmatprep.subr.bf16.mxu1 %v3698_v53 }
 0x19e   : > { %1470 = vmatpush1.bf16.msra.mxu0 %v3693_v35  ;;  %1513 = vmatpush1.bf16.msra.mxu1 %v3696_v54 }
 0x19f   : > { %1471 = vmatprep.subr.bf16.mxu0 %v3701_v55  ;;  %1514 = vmatprep.subr.bf16.mxu1 %v3704_v56  ;;  %v769_v55 = vsub.s32 6, %v4467_v6 }
 0x1a2   : > { %1472 = vmatpush1.bf16.msra.mxu0 %v3699_v57  ;;  %1515 = vmatpush1.bf16.msra.mxu1 %v3702_v58 }
 0x1a3   : > { %1473 = vmatprep.subr.bf16.mxu0 %v3707_v59  ;;  %1516 = vmatprep.subr.bf16.mxu1 %v3710_v60  ;;  %v770_v59 = vrot.slane %v739_v8, %v769_v55 }
 0x1a6   : > { %1474 = vmatpush1.bf16.msra.mxu0 %v3705_v61  ;;  %1517 = vmatpush1.bf16.msra.mxu1 %v3708_v62 }
 0x1a7   : > { %1475 = vmatprep.subr.bf16.mxu0 %v3713_v63  ;;  %1518 = vmatprep.subr.bf16.mxu1 %v3716_v0  ;;  %v740_v63 = vld [vmem:[%s4330_s18 + $0x8] sm:$0xf] }
 0x1a8   : > { %v778_v0 = vrot.slane %v740_v63, %v4479_v15 }
 0x1aa   : > { %1476 = vmatpush1.bf16.msra.mxu0 %v3711_v1  ;;  %1519 = vmatpush1.bf16.msra.mxu1 %v3714_v3  ;;  %v790_v1 = vrot.slane %v740_v63, %v4493_v40 }
 0x1ab   : > { %3363 = vmatprep.subr.bf16.mxu1 %v4022_v4  ;;  %3357 = vmatprep.subr.bf16.mxu0 %v4022_v4 }
 0x1ad   : > { %1494 = vmatmul.mubr.bf16.vlgmr.msra.gmra.mxu0 %v4385_v2  ;;  %1537 = vmatmul.mubr.bf16.vlgmr.msra.gmra.mxu1 %v4385_v2  ;;  %v4473_v2 = vsub.s32 1, %v4467_v6 }
 0x1ae   : > { %3359 = vmatprep.mubr.msk.bf16.mxu0 %vm4023_vm0, %v4022_v4  ;;  %3365 = vmatprep.mubr.msk.bf16.mxu1 %vm4023_vm0, %v4022_v4 }
 0x1af   : > { %v750_v12 = vrot.slane %v739_v8, %v4473_v2 }
 0x22d   : > { %v1323_v9 = vpop.f32.mrf.mxu0  ;;  %v1366_v10 = vpop.f32.mrf.mxu1 }
 0x22e   : > { %v1367_v18 = vadd.f32 %v1366_v10, %v754_v11  ;;  %v1324_v26 = vadd.f32 %v1323_v9, %v746_v24  ;;  %v786_v9 = vrot.slane %v740_v63, %v4470_v7 }
 0x22f   : > { %v1325_v13 = vpop.f32.mrf.mxu0  ;;  %v1368_v14 = vpop.f32.mrf.mxu1 }
 0x230   : > { %v1326_v19 = vadd.f32 %v1325_v13, %v750_v12  ;;  %v1369_v54 = vadd.f32 %v1368_v14, %v758_v49 }
 0x231   : > { %v1327_v16 = vpop.f32.mrf.mxu0  ;;  %v1370_v17 = vpop.f32.mrf.mxu1 }
 0x232   : > { %v1371_v20 = vadd.f32 %v1370_v17, %v754_v11  ;;  %v1328_v27 = vadd.f32 %v1327_v16, %v746_v24 }
 0x233   : > { %v1329_v21 = vpop.f32.mrf.mxu0  ;;  %v1372_v31 = vpop.f32.mrf.mxu1 }
 0x234   : > { %v1551_v22 = vpack.c.bf16 %v1371_v20, %v1367_v18  ;;  %v1330_v23 = vadd.f32 %v1329_v21, %v750_v12  ;;  %v1549_v28 = vpack.c.bf16 %v1328_v27, %v1324_v26  ;;  %v1373_v53 = vadd.f32 %v1372_v31, %v758_v49  ;;  %v1547_v31 = vld [vmem:[%s4745_s21] sm:$0xff] }
 0x236   : > { %v1550_v25 = vpack.c.bf16 %v1330_v23, %v1326_v19  ;;  %3364 = vmatpush3.bf16.msra.mxu1 %v1551_v22  ;;  %v1661_v57 = vpack.c.bf16 %v1373_v53, %v1369_v54  ;;  %v782_v19 = vrot.slane %v740_v63, %v4473_v2 }
 0x237   : > { %3375 = vmatprep.subr.bf16.mxu1 %v4022_v4 }
 0x238   : > { %3358 = vmatpush3.bf16.xpose.msra.mxu0 %v1550_v25 }
 0x239   : > { %3369 = vmatprep.subr.bf16.mxu0 %v4022_v4 }
 0x23f   : > { %3360 = vmatmul.mubr.bf16.vlgmr.msra.gmra.mxu0 %v1549_v28 }
 0x240   : > { %3371 = vmatprep.mubr.msk.bf16.mxu0 %vm4023_vm0, %v4022_v4 }
 0x24d   : > { %v1409_v33 = vpop.f32.mrf.mxu0  ;;  %v1452_v34 = vpop.f32.mrf.mxu1 }
 0x24e   : > { %v1410_v39 = vadd.f32 %v1409_v33, %v762_v32  ;;  %v1453_v61 = vadd.f32 %v1452_v34, %v770_v59 }
 0x24f   : > { %v1411_v37 = vpop.f32.mrf.mxu0  ;;  %v1454_v38 = vpop.f32.mrf.mxu1 }
 0x250   : > { %v4495_v43 = vadd.f32 %v1411_v37, %v766_v36  ;;  %v1455_v56 = vadd.f32 %v1454_v38, %v774_v51 }
 0x251   : > { %v1413_v41 = vpop.f32.mrf.mxu0  ;;  %v1456_v42 = vpop.f32.mrf.mxu1 }
 0x252   : > { %v1414_v45 = vadd.f32 %v1413_v41, %v762_v32  ;;  %v1457_v60 = vadd.f32 %v1456_v42, %v770_v59 }
 0x253   : > { %v1415_v46 = vpop.f32.mrf.mxu0  ;;  %v1458_v50 = vpop.f32.mrf.mxu1 }
 0x254   : > { %v1662_v47 = vpack.c.bf16 %v1414_v45, %v1410_v39  ;;  %v4498_v48 = vadd.f32 %v1415_v46, %v766_v36  ;;  %v1459_v35 = vadd.f32 %v1458_v50, %v774_v51  ;;  %v1772_v62 = vpack.c.bf16 %v1457_v60, %v1453_v61  ;;  %v1548_v36 = vld [vmem:[%s4746_s13 + $0x8] sm:$0xff] }
 0x256   : > { %v1663_v52 = vpack.c.bf16 %v4498_v48, %v4495_v43  ;;  %3370 = vmatpush3.bf16.xpose.msra.mxu0 %v1662_v47  ;;  %v1773_v58 = vpack.c.bf16 %v1459_v35, %v1455_v56 }
 0x257   : > { %3381 = vmatprep.subr.bf16.mxu0 %v4022_v4 }
 0x25d   : > { %3372 = vmatmul.mubr.bf16.vlgmr.msra.gmra.mxu0 %v1661_v57 }
 0x25e   : > { %3382 = vmatpush3.bf16.xpose.msra.mxu0 %v1773_v58  ;;  %3383 = vmatprep.mubr.msk.bf16.mxu0 %vm4023_vm0, %v4022_v4 }
 0x25f   : > { %3393 = vmatprep.subr.bf16.mxu0 %v4022_v4 }
 0x265   : > { %3384 = vmatmul.mubr.bf16.vlgmr.msra.gmra.mxu0 %v1772_v62 }
 0x266   : > { %3395 = vmatprep.mubr.msk.bf16.mxu0 %vm4023_vm0, %v4022_v4 }
 0x26d   : > { %v1495_v3 = vpop.f32.mrf.mxu0  ;;  %v1538_v5 = vpop.f32.mrf.mxu1 }
 0x26e   : > { %v4515_v8 = vadd.f32 %v1495_v3, %v778_v0  ;;  %v1539_v16 = vadd.f32 %v1538_v5, %v786_v9 }
 0x26f   : > { %v1497_v10 = vpop.f32.mrf.mxu0  ;;  %v1540_v11 = vpop.f32.mrf.mxu1 }
 0x270   : > { %v4518_v12 = vadd.f32 %v1540_v11, %v790_v1  ;;  %v1498_v26 = vadd.f32 %v1497_v10, %v782_v19 }
 0x271   : > { %v1499_v13 = vpop.f32.mrf.mxu0  ;;  %v1542_v14 = vpop.f32.mrf.mxu1 }
 0x272   : > { %v4520_v17 = vadd.f32 %v1499_v13, %v778_v0  ;;  %v1543_v18 = vadd.f32 %v1542_v14, %v786_v9 }
 0x273   : > { %v1544_v20 = vpop.f32.mrf.mxu1  ;;  %v1501_v23 = vpop.f32.mrf.mxu0 }
 0x274   : > { %v1774_v21 = vpack.c.bf16 %v4520_v17, %v4515_v8  ;;  %v1884_v22 = vpack.c.bf16 %v1543_v18, %v1539_v16  ;;  %v4525_v24 = vadd.f32 %v1544_v20, %v790_v1  ;;  %v1502_v27 = vadd.f32 %v1501_v23, %v782_v19 }
 0x276   : > { %v1885_v25 = vpack.c.bf16 %v4525_v24, %v4518_v12  ;;  %3394 = vmatpush3.bf16.xpose.msra.mxu0 %v1884_v22  ;;  %v1883_v28 = vpack.c.bf16 %v1502_v27, %v1498_v26  ;;  %v3717_v12 = vld [vmem:[%s4325_s29 + $0x78] sm:$0xff]  }
 0x277   : > { %v3718_v24 = vld [vmem:[%s4325_s29 + $0x38] sm:$0xff]   ;;  %3277 = vmatprep.subr.bf16.mxu0 %v3717_v12 }
 0x27d   : > { %3396 = vmatmul.mubr.bf16.vlgmr.msra.gmra.mxu0 %v1883_v28 }
 0x27e   : > { %3278 = vmatpush3.bf16.msra.mxu0 %v3718_v24 }
 0x2ff   : > { %v1586_v32 = vpop.f32.mrf.mxu0 }
 0x300   : > { %v1587_v33 = vadd.f32 %v1586_v32, %v1547_v31 }
 0x301   : > { %v3361_v34 = vpop.f32.mrf.mxu0 }
 0x302   : > { %v1594_v37 = vsel %vm1593_vm1, %v1587_v33, -inf }
 0x303   : > { %1595 = vmax.xlane.f32.xlu0 %v1594_v37  ;;  %v1589_v38 = vpop.f32.mrf.mxu0 }
 0x304   : > { %v1590_v39 = vadd.f32 %v1589_v38, %v1548_v36 }
 0x305   : > { %v3362_v41 = vpop.f32.mrf.mxu0 }
 0x306   : > { %v1597_v42 = vsel %vm1593_vm1, %v1590_v39, -inf }
 0x307   : > { %1598 = vmax.xlane.f32.xlu0 %v1597_v42 }
 0x31d   : > { %v1698_v44 = vpop.f32.mrf.mxu0 }
 0x31e   : > { %v1699_v45 = vadd.f32 %v1698_v44, %v1547_v31 }
 0x31f   : > { %v3373_v46 = vpop.f32.mrf.mxu0 }
 0x320   : > { %v1705_v47 = vsel %vm1593_vm1, %v1699_v45, -inf }
 0x321   : > { %1706 = vmax.xlane.f32.xlu1 %v1705_v47  ;;  %v1701_v49 = vpop.f32.mrf.mxu0 }
 0x322   : > { %v1702_v50 = vadd.f32 %v1701_v49, %v1548_v36 }
 0x323   : > { %v3374_v51 = vpop.f32.mrf.mxu0 }
 0x324   : > { %v1708_v53 = vsel %vm1593_vm1, %v1702_v50, -inf }
 0x325   : > { %1709 = vmax.xlane.f32.xlu1 %v1708_v53  ;;  %v1809_v35 = vpop.f32.mrf.mxu0 }
 0x326   : > { %v1810_v54 = vadd.f32 %v1809_v35, %v1547_v31 }
 0x327   : > { %v3385_v56 = vpop.f32.mrf.mxu0 }
 0x328   : > { %v1816_v57 = vsel %vm1593_vm1, %v1810_v54, -inf }
 0x329   : > { %1817 = vmax.xlane.f32.xlu0 %v1816_v57  ;;  %v1812_v58 = vpop.f32.mrf.mxu0 }
 0x32a   : > { %v1813_v59 = vadd.f32 %v1812_v58, %v1548_v36 }
 0x32b   : > { %v3386_v60 = vpop.f32.mrf.mxu0 }
 0x32c   : > { %v1819_v61 = vsel %vm1593_vm1, %v1813_v59, -inf }
 0x32d   : > { %1820 = vmax.xlane.f32.xlu1 %v1819_v61 }
 0x33d   : > { %v1920_v62 = vpop.f32.mrf.mxu0 }
 0x33e   : > { %v1921_v63 = vadd.f32 %v1920_v62, %v1547_v31 }
 0x33f   : > { %v3397_v0 = vpop.f32.mrf.mxu0 }
 0x340   : > { %v1927_v1 = vsel %vm1593_vm1, %v1921_v63, -inf }
 0x341   : > { %1928 = vmax.xlane.f32.xlu0 %v1927_v1  ;;  %v1923_v3 = vpop.f32.mrf.mxu0 }
 0x342   : > { %v1924_v5 = vadd.f32 %v1923_v3, %v1548_v36 }
 0x343   : > { %v3398_v9 = vpop.f32.mrf.mxu0 }
 0x344   : > { %v1930_v10 = vsel %vm1593_vm1, %v1924_v5, -inf }
 0x345   : > { %1931 = vmax.xlane.f32.xlu1 %v1930_v10 }
 0x38c   : > { %v1596_v11 = vpop.xlane.xlu0 %1595 }
 0x38d   : > { %v1600_v13 = vsub.f32 %v1587_v33, %v1596_v11 }
 0x38f   : > { %v1602_v14 = vmul.f32 1.442695, %v1600_v13 }
 0x390   : > { %v1599_v16 = vpop.xlane.xlu0 %1598 }
 0x391   : > { %3766 = vpow2.f32 %v1602_v14  ;;  %v1601_v18 = vsub.f32 %v1590_v39, %v1599_v16 }
 0x393   : > { %v1604_v19 = vmul.f32 1.442695, %v1601_v18 }
 0x395   : > { %3768 = vpow2.f32 %v1604_v19 }
 0x39e   : > { %v3767_v20 = vpop.eup %3766 }
 0x39f   : > { %v1606_v22 = vsel %vm1593_vm1, %v3767_v20, 0.0 }
 0x3a0   : > { %1607 = vadd.xlane.f32.xlu0 %v1606_v22 }
 0x3a2   : > { %v3769_v23 = vpop.eup %3768 }
 0x3a3   : > { %v1609_v26 = vsel %vm1593_vm1, %v3769_v23, 0.0 }
 0x3a4   : > { %1610 = vadd.xlane.f32.xlu1 %v1609_v26 }
 0x3aa   : > { %v1707_v27 = vpop.xlane.xlu1 %1706 }
 0x3ab   : > { %v1711_v28 = vsub.f32 %v1699_v45, %v1707_v27 }
 0x3ad   : > { %v1713_v31 = vmul.f32 1.442695, %v1711_v28 }
 0x3ae   : > { %v1710_v32 = vpop.xlane.xlu1 %1709 }
 0x3af   : > { %3770 = vpow2.f32 %v1713_v31  ;;  %v1712_v33 = vsub.f32 %v1702_v50, %v1710_v32 }
 0x3b1   : > { %v1715_v34 = vmul.f32 1.442695, %v1712_v33 }
 0x3b2   : > { %v1818_v36 = vpop.xlane.xlu0 %1817 }
 0x3b3   : > { %3772 = vpow2.f32 %v1715_v34  ;;  %v1822_v37 = vsub.f32 %v1810_v54, %v1818_v36  ;;  %v3720_v36 = vld [vmem:[%s4325_s29 + $0x30] sm:$0xff]  }
 0x3b5   : > { %v1824_v38 = vmul.f32 1.442695, %v1822_v37  ;;  %v3721_v37 = vld [vmem:[%s4325_s29 + $0x68] sm:$0xff]  }
 0x3b6   : > { %v1821_v39 = vpop.xlane.xlu1 %1820 }
 0x3b7   : > { %3774 = vpow2.f32 %v1824_v38  ;;  %v1823_v41 = vsub.f32 %v1813_v59, %v1821_v39  ;;  %v3722_v38 = vld [vmem:[%s4325_s29 + $0x28] sm:$0xff]   ;;  %v3723_v39 = vld [vmem:[%s4325_s29 + $0x60] sm:$0xff]  }
 0x3b9   : > { %v1826_v42 = vmul.f32 1.442695, %v1823_v41  ;;  %v3724_v41 = vld [vmem:[%s4325_s29 + $0x20] sm:$0xff]  }
 0x3bb   : > { %3776 = vpow2.f32 %v1826_v42  ;;  %v3725_v42 = vld [vmem:[%s4325_s29 + $0x58] sm:$0xff]  }
 0x3bc   : > { %v3771_v44 = vpop.eup %3770 }
 0x3bd   : > { %v1717_v46 = vsel %vm1593_vm1, %v3771_v44, 0.0 }
 0x3be   : > { %1718 = vadd.xlane.f32.xlu0 %v1717_v46  ;;  %v3727_v46 = vld [vmem:[%s4325_s29 + $0x50] sm:$0xff]  }
 0x3c0   : > { %v3773_v47 = vpop.eup %3772 }
 0x3c1   : > { %v1720_v45 = vsel %vm1593_vm1, %v3773_v47, 0.0 }
 0x3c2   : > { %1721 = vadd.xlane.f32.xlu1 %v1720_v45  ;;  %v3729_v45 = vld [vmem:[%s4325_s29 + $0x48] sm:$0xff]  }
 0x3c4   : > { %v3775_v49 = vpop.eup %3774 }
 0x3c5   : > { %v1828_v50 = vsel %vm1593_vm1, %v3775_v49, 0.0 }
 0x3c6   : > { %1829 = vadd.xlane.f32.xlu0 %v1828_v50  ;;  %v3731_v50 = vld [vmem:[%s4325_s29 + $0x40] sm:$0xff]  }
 0x3c8   : > { %v3777_v51 = vpop.eup %3776 }
 0x3c9   : > { %v1831_v53 = vsel %vm1593_vm1, %v3777_v51, 0.0 }
 0x3ca   : > { %v1929_v35 = vpop.xlane.xlu0 %1928  ;;  %1832 = vadd.xlane.f32.xlu1 %v1831_v53  ;;  %v3733_v53 = vld [vmem:[%s4325_s29 + $0xf8] sm:$0xff]  }
 0x3cb   : > { %v1933_v54 = vsub.f32 %v1921_v63, %v1929_v35  ;;  %v3734_v35 = vld [vmem:[%s4325_s29 + $0xb8] sm:$0xff]  }
 0x3cd   : > { %v1935_v56 = vmul.f32 1.442695, %v1933_v54  ;;  %v3735_v54 = vld [vmem:[%s4325_s29 + $0xf0] sm:$0xff]  }
 0x3ce   : > { %v1932_v57 = vpop.xlane.xlu1 %1931 }
 0x3cf   : > { %3778 = vpow2.f32 %v1935_v56  ;;  %v1934_v58 = vsub.f32 %v1924_v5, %v1932_v57  ;;  %v3736_v56 = vld [vmem:[%s4325_s29 + $0xb0] sm:$0xff]   ;;  %v3737_v57 = vld [vmem:[%s4325_s29 + $0xe8] sm:$0xff]  }
 0x3d1   : > { %v1937_v59 = vmul.f32 1.442695, %v1934_v58  ;;  %v3738_v58 = vld [vmem:[%s4325_s29 + $0xa8] sm:$0xff]  }
 0x3d3   : > { %3780 = vpow2.f32 %v1937_v59  ;;  %v3739_v59 = vld [vmem:[%s4325_s29 + $0xe0] sm:$0xff]  }
 0x3dc   : > { %v3779_v60 = vpop.eup %3778 }
 0x3dd   : > { %v1939_v61 = vsel %vm1593_vm1, %v3779_v60, 0.0 }
 0x3de   : > { %1940 = vadd.xlane.f32.xlu0 %v1939_v61  ;;  %v3741_v61 = vld [vmem:[%s4325_s29 + $0xd8] sm:$0xff]  }
 0x3e0   : > { %v3781_v62 = vpop.eup %3780 }
 0x3e1   : > { %v1942_v0 = vsel %vm1593_vm1, %v3781_v62, 0.0 }
 0x3e2   : > { %1943 = vadd.xlane.f32.xlu1 %v1942_v0  ;;  %v3743_v0 = vld [vmem:[%s4325_s29 + $0xd0] sm:$0xff]  }
 0x429   : > { %v1608_v1 = vpop.xlane.xlu0 %1607 }
 0x42a   : > { %3782 = vrcp.f32 %v1608_v1  ;;  %v3744_v1 = vld [vmem:[%s4325_s29 + $0x90] sm:$0xff]  }
 0x42d   : > { %v1611_v3 = vpop.xlane.xlu1 %1610 }
 0x42e   : > { %3784 = vrcp.f32 %v1611_v3  ;;  %v3745_v3 = vld [vmem:[%s4325_s29 + $0xc8] sm:$0xff]  }
 0x437   : > { %v3783_v9 = vpop.eup %3782 }
 0x438   : > { %v1614_v10 = vmul.f32 %v3783_v9, %v3767_v20  ;;  %v3746_v9 = vld [vmem:[%s4325_s29 + $0x88] sm:$0xff]  }
 0x43b   : > { %v3785_v63 = vpop.eup %3784 }
 0x43c   : > { %v1615_v11 = vmul.f32 %v3785_v63, %v3769_v23  ;;  %v3747_v63 = vld [vmem:[%s4325_s29 + $0xc0] sm:$0xff]  }
 0x43e   : > { %v1616_v13 = vpack.c.bf16 %v1615_v11, %v1614_v10  ;;  %v3748_v10 = vld [vmem:[%s4325_s29 + $0x80] sm:$0xff]  }
 0x440   : > { %3366 = vmatmul.mubr.msk.bf16.vlgmr.msra.gmra.mxu1 %vm1593_vm1, %v1616_v13 }
 0x441   : > { %3376 = vmatpush3.bf16.msra.mxu1 %v1663_v52  ;;  %3377 = vmatprep.mubr.msk.bf16.mxu1 %vm4023_vm0, %v4022_v4 }
 0x442   : > { %3387 = vmatprep.subr.bf16.mxu1 %v4022_v4 }
 0x447   : > { %v1719_v5 = vpop.xlane.xlu0 %1718 }
 0x448   : > { %3786 = vrcp.f32 %v1719_v5 }
 0x44b   : > { %v1722_v14 = vpop.xlane.xlu1 %1721 }
 0x44c   : > { %3788 = vrcp.f32 %v1722_v14 }
 0x44f   : > { %v1830_v16 = vpop.xlane.xlu0 %1829 }
 0x450   : > { %3790 = vrcp.f32 %v1830_v16 }
 0x453   : > { %v1833_v18 = vpop.xlane.xlu1 %1832 }
 0x454   : > { %3792 = vrcp.f32 %v1833_v18 }
 0x455   : > { %v3787_v19 = vpop.eup %3786 }
 0x456   : > { %v1725_v22 = vmul.f32 %v3787_v19, %v3771_v44  ;;  %v3726_v44 = vld [vmem:[%s4325_s29 + $0x18] sm:$0xff]  }
 0x459   : > { %v3789_v20 = vpop.eup %3788 }
 0x45a   : > { %v1726_v23 = vmul.f32 %v3789_v20, %v3773_v47  ;;  %v3728_v47 = vld [vmem:[%s4325_s29 + $0x10] sm:$0xff]  }
 0x45c   : > { %v1727_v26 = vpack.c.bf16 %v1726_v23, %v1725_v22 }
 0x45d   : > { %v3791_v43 = vpop.eup %3790 }
 0x45e   : > { %3378 = vmatmul.mubr.msk.bf16.vlgmr.msra.gmra.mxu1 %vm1593_vm1, %v1727_v26  ;;  %v1836_v52 = vmul.f32 %v3791_v43, %v3775_v49  ;;  %v3730_v49 = vld [vmem:[%s4325_s29 + $0x8] sm:$0xff]  }
 0x45f   : > { %3388 = vmatpush3.bf16.msra.mxu1 %v1774_v21  ;;  %3389 = vmatprep.mubr.msk.bf16.mxu1 %vm4023_vm0, %v4022_v4 }
 0x460   : > { %3399 = vmatprep.subr.bf16.mxu1 %v4022_v4 }
 0x461   : > { %v3793_v48 = vpop.eup %3792 }
 0x462   : > { %v1837_v27 = vmul.f32 %v3793_v48, %v3777_v51  ;;  %v3732_v51 = vld [vmem:[%s4325_s29] sm:$0xff]  }
 0x464   : > { %v1838_v28 = vpack.c.bf16 %v1837_v27, %v1836_v52 }
 0x466   : > { %3390 = vmatmul.mubr.msk.bf16.vlgmr.msra.gmra.mxu1 %vm1593_vm1, %v1838_v28 }
 0x467   : > { %3400 = vmatpush3.bf16.msra.mxu1 %v1885_v25  ;;  %v1941_v8 = vpop.xlane.xlu0 %1940  ;;  %3401 = vmatprep.mubr.msk.bf16.mxu1 %vm4023_vm0, %v4022_v4  ;;  %v3719_v25 = vld [vmem:[%s4325_s29 + $0x70] sm:$0xff]  }
 0x468   : > { %3794 = vrcp.f32 %v1941_v8  ;;  %3279 = vmatprep.subr.bf16.mxu0 %v3719_v25  ;;  %3299 = vmatprep.subr.bf16.mxu1 %v3733_v53 }
 0x469   : > { %3280 = vmatpush3.bf16.msra.mxu0 %v3720_v36 }
 0x46a   : > { %3281 = vmatprep.subr.bf16.mxu0 %v3721_v37 }
 0x46b   : > { %v1944_v17 = vpop.xlane.xlu1 %1943 }
 0x46c   : > { %3796 = vrcp.f32 %v1944_v17 }
 0x46d   : > { %3282 = vmatpush3.bf16.msra.mxu0 %v3722_v38 }
 0x46e   : > { %3283 = vmatprep.subr.bf16.mxu0 %v3723_v39 }
 0x471   : > { %3284 = vmatpush3.bf16.msra.mxu0 %v3724_v41 }
 0x472   : > { %3285 = vmatprep.subr.bf16.mxu0 %v3725_v42 }
 0x475   : > { %v3795_v21 = vpop.eup %3794  ;;  %3286 = vmatpush3.bf16.msra.mxu0 %v3726_v44  ;;  %v3810_v44 = vld [vmem:[#allocation2] sm:$0xff]  }
 0x476   : > { %v1947_v32 = vmul.f32 %v3795_v21, %v3779_v60  ;;  %3287 = vmatprep.subr.bf16.mxu0 %v3727_v46  ;;  %v3740_v60 = vld [vmem:[%s4325_s29 + $0xa0] sm:$0xff]   ;;  %v640_v46 = vunpack.c.l.bf16 %v3810_v44 }
 0x479   : > { %v3797_v31 = vpop.eup %3796  ;;  %3288 = vmatpush3.bf16.msra.mxu0 %v3728_v47 }
 0x47a   : > { %v1948_v33 = vmul.f32 %v3797_v31, %v3781_v62  ;;  %3289 = vmatprep.subr.bf16.mxu0 %v3729_v45  ;;  %v3742_v62 = vld [vmem:[%s4325_s29 + $0x98] sm:$0xff]  }
 0x47c   : > { %v1949_v34 = vpack.c.bf16 %v1948_v33, %v1947_v32 }
 0x47d   : > { %3290 = vmatpush3.bf16.msra.mxu0 %v3730_v49 }
 0x47e   : > { %3402 = vmatmul.mubr.msk.bf16.vlgmr.msra.gmra.mxu1 %vm1593_vm1, %v1949_v34  ;;  %3291 = vmatprep.subr.bf16.mxu0 %v3731_v50  ;;  %v4611_v34 = vld [vmem:[%s4335_s26] sm:$0xff]  ;;  %s4748_s26 = sld [smem:[#allocation22_spill]] (!%p3222_p2) }
 0x47f   : > { %3300 = vmatpush3.bf16.msra.mxu1 %v3734_v35  ;;  %v2065_v24 = vrot.slane %v4611_v34, %v4479_v15  ;;  %v641_v35 = vunpack.c.h.bf16 %v3810_v44  ;;  %v3764_v44 = vld [vmem:[%s4314_s14] sm:$0xff]  }
 0x480   : > { %3301 = vmatprep.subr.bf16.mxu1 %v3735_v54 }
 0x481   : > { %3292 = vmatpush3.bf16.msra.mxu0 %v3732_v51 }
 0x482   : > { %3405 = vmatprep.subr.bf16.mxu0 %v4022_v4 }
 0x483   : > { %3302 = vmatpush3.bf16.msra.mxu1 %v3736_v56 }
 0x484   : > { %3303 = vmatprep.subr.bf16.mxu1 %v3737_v57 }
 0x487   : > { %3304 = vmatpush3.bf16.msra.mxu1 %v3738_v58  ;;  %v3749_v58 = vld [vmem:[%s4308_s27 + $0x38] sm:$0xff]  }
 0x488   : > { %3305 = vmatprep.subr.bf16.mxu1 %v3739_v59  ;;  %v3750_v59 = vld [vmem:[%s4308_s27 + $0x30] sm:$0xff]  }
 0x48b   : > { %3306 = vmatpush3.bf16.msra.mxu1 %v3740_v60  ;;  %v3751_v60 = vld [vmem:[%s4308_s27 + $0x28] sm:$0xff]  }
 0x48c   : > { %3307 = vmatprep.subr.bf16.mxu1 %v3741_v61  ;;  %v3752_v61 = vld [vmem:[%s4308_s27 + $0x20] sm:$0xff]  }
 0x48f   : > { %3308 = vmatpush3.bf16.msra.mxu1 %v3742_v62  ;;  %v3753_v62 = vld [vmem:[%s4308_s27 + $0x18] sm:$0xff]  }
 0x490   : > { %3309 = vmatprep.subr.bf16.mxu1 %v3743_v0  ;;  %v3754_v0 = vld [vmem:[%s4308_s27 + $0x10] sm:$0xff]  }
 0x493   : > { %3310 = vmatpush3.bf16.msra.mxu1 %v3744_v1  ;;  %v3755_v1 = vld [vmem:[%s4308_s27 + $0x8] sm:$0xff]  }
 0x494   : > { %3311 = vmatprep.subr.bf16.mxu1 %v3745_v3  ;;  %v3756_v3 = vld [vmem:[%s4308_s27] sm:$0xff]  }
 0x497   : > { %3312 = vmatpush3.bf16.msra.mxu1 %v3746_v9 }
 0x498   : > { %3313 = vmatprep.subr.bf16.mxu1 %v3747_v63 }
 0x49b   : > { %3314 = vmatpush3.bf16.msra.mxu1 %v3748_v10 }
 0x49c   : > { %3425 = vmatprep.subr.bf16.mxu1 %v4022_v4 }
 0x500   : > { %v1654_v11 = vpop.f32.mrf.mxu1 }
 0x502   : > { %v3367_v13 = vpop.f32.mrf.mxu1 }
 0x504   : > { %v1657_v5 = vpop.f32.mrf.mxu1 }
 0x505   : > { %v1994_v22 = vpack.c.bf16 %v1657_v5, %v1654_v11 }
 0x506   : > { %v3368_v14 = vpop.f32.mrf.mxu1 }
 0x51e   : > { %v1765_v16 = vpop.f32.mrf.mxu1 }
 0x520   : > { %v3379_v18 = vpop.f32.mrf.mxu1 }
 0x522   : > { %v1768_v19 = vpop.f32.mrf.mxu1 }
 0x523   : > { %v1995_v20 = vpack.c.bf16 %v1768_v19, %v1765_v16 }
 0x524   : > { %v3380_v23 = vpop.f32.mrf.mxu1 }
 0x525   : > { %2290 = vmatprep.mubr.bf16.mxu0 %v1995_v20 }
 0x526   : > { %v1876_v26 = vpop.f32.mrf.mxu1  ;;  %2291 = vmatmul.mubr.bf16.vlgmr.msra.gmra.mxu0 %v1994_v22 }
 0x527   : > { %3421 = vmatprep.mubr.msk.bf16.mxu0 %vm4023_vm0, %v4022_v4  ;;  %3406 = vmatpush3.bf16.msra.mxu0 %v3749_v58 }
 0x528   : > { %v3391_v43 = vpop.f32.mrf.mxu1  ;;  %3407 = vmatprep.subr.bf16.mxu0 %v4022_v4 }
 0x52a   : > { %v1879_v48 = vpop.f32.mrf.mxu1 }
 0x52b   : > { %v1996_v21 = vpack.c.bf16 %v1879_v48, %v1876_v26  ;;  %3408 = vmatpush3.bf16.msra.mxu0 %v3750_v59 }
 0x52c   : > { %v3392_v52 = vpop.f32.mrf.mxu1  ;;  %3409 = vmatprep.subr.bf16.mxu0 %v4022_v4 }
 0x52f   : > { %3410 = vmatpush3.bf16.msra.mxu0 %v3751_v60 }
 0x530   : > { %3411 = vmatprep.subr.bf16.mxu0 %v4022_v4 }
 0x533   : > { %3412 = vmatpush3.bf16.msra.mxu0 %v3752_v61 }
 0x534   : > { %3413 = vmatprep.subr.bf16.mxu0 %v4022_v4 }
 0x537   : > { %3414 = vmatpush3.bf16.msra.mxu0 %v3753_v62 }
 0x538   : > { %3415 = vmatprep.subr.bf16.mxu0 %v4022_v4 }
 0x53b   : > { %3416 = vmatpush3.bf16.msra.mxu0 %v3754_v0 }
 0x53c   : > { %3417 = vmatprep.subr.bf16.mxu0 %v4022_v4 }
 0x53e   : > { %v1987_v27 = vpop.f32.mrf.mxu1 }
 0x53f   : > { %3418 = vmatpush3.bf16.msra.mxu0 %v3755_v1 }
 0x540   : > { %v3403_v28 = vpop.f32.mrf.mxu1  ;;  %3419 = vmatprep.subr.bf16.mxu0 %v4022_v4 }
 0x541   : > { %v2373_v28 = vrot.slane %v4611_v34, %v4473_v2  ;;  %v3757_v2 = vld [vmem:[%s4314_s14 + $0x38] sm:$0xff]  }
 0x542   : > { %v1990_v8 = vpop.f32.mrf.mxu1 }
 0x543   : > { %v1997_v17 = vpack.c.bf16 %v1990_v8, %v1987_v27  ;;  %3420 = vmatpush3.bf16.msra.mxu0 %v3756_v3 }
 0x544   : > { %v3404_v31 = vpop.f32.mrf.mxu1 }
 0x545   : > { %2331 = vmatprep.mubr.bf16.mxu1 %v1997_v17 }
 0x546   : > { %2332 = vmatmul.mubr.bf16.vlgmr.msra.gmra.mxu1 %v1996_v21 }
 0x547   : > { %3441 = vmatprep.mubr.msk.bf16.mxu1 %vm4023_vm0, %v4022_v4  ;;  %3426 = vmatpush3.bf16.msra.mxu1 %v3757_v2 }
 0x548   : > { %3427 = vmatprep.subr.bf16.mxu1 %v4022_v4 }
 0x5e6   : > { %v3293_v32 = vpop.f32.mrf.mxu0 }
 0x5e8   : > { %v3294_v33 = vpop.f32.mrf.mxu0 }
 0x5e9   : > { %v3295_v25 = vadd.f32 %v3294_v33, %v3293_v32  ;;  %v2379_v33 = vrot.slane %v4611_v34, %v4470_v7  ;;  %v3759_v7 = vld [vmem:[%s4314_s14 + $0x28] sm:$0xff]  }
 0x5ea   : > { %v3296_v12 = vpop.f32.mrf.mxu0 }
 0x5eb   : > { %v2293_v39 = vadd.f32 %v3295_v25, %v2065_v24 }
 0x5ec   : > { %v3297_v36 = vpop.f32.mrf.mxu0 }
 0x5ed   : > { %v3298_v41 = vadd.f32 %v3297_v36, %v3296_v12 }
 0x5ef   : > { %v2296_v50 = vadd.f32 %v3298_v41, %v2065_v24  ;;  %v3762_v41 = vld [vmem:[%s4314_s14 + $0x10] sm:$0xff]  }
 0x606   : > { %v3315_v37 = vpop.f32.mrf.mxu1 }
 0x608   : > { %v3316_v38 = vpop.f32.mrf.mxu1 }
 0x609   : > { %v3317_v42 = vadd.f32 %v3316_v38, %v3315_v37  ;;  %v3758_v37 = vld [vmem:[%s4314_s14 + $0x30] sm:$0xff]   ;;  %v3760_v38 = vld [vmem:[%s4314_s14 + $0x20] sm:$0xff]  }
 0x60a   : > { %v3318_v47 = vpop.f32.mrf.mxu1  ;;  %3428 = vmatpush3.bf16.msra.mxu1 %v3758_v37  ;;  %v2653_v37 = vrot.slane %v4611_v34, %v765_v30 }
 0x60b   : > { %v2334_v45 = vadd.f32 %v3317_v42, %v2293_v39  ;;  %3429 = vmatprep.subr.bf16.mxu1 %v4022_v4  ;;  %v3761_v39 = vld [vmem:[%s4314_s14 + $0x18] sm:$0xff]   ;;  %v3763_v42 = vld [vmem:[%s4314_s14 + $0x8] sm:$0xff]   ;;  %s4747_s14 = sld [smem:[#allocation21_spill]] (!%p3222_p2) }
 0x60c   : > { %v3319_v49 = vpop.f32.mrf.mxu1 }
 0x60d   : > { %v3320_v51 = vadd.f32 %v3319_v49, %v3318_v47  ;;  %v2340_v53 = vadd.f32 %v2334_v45, %v640_v46  ;;  %v2402_v46 = vrot.slane %v4611_v34, %v4493_v40 }
 0x60e   : > { %3430 = vmatpush3.bf16.msra.mxu1 %v3759_v7 }
 0x60f   : > { %v2337_v15 = vadd.f32 %v3320_v51, %v2296_v50  ;;  %2342 = vadd.xlane.f32.xlu0 %v2340_v53  ;;  %v2348_v56 = vmul.f32 %v2340_v53, %v2340_v53  ;;  %3431 = vmatprep.subr.bf16.mxu1 %v4022_v4 }
 0x611   : > { %v2341_v54 = vadd.f32 %v2337_v15, %v641_v35 }
 0x612   : > { %3432 = vmatpush3.bf16.msra.mxu1 %v3760_v38 }
 0x613   : > { %2344 = vadd.xlane.f32.xlu1 %v2341_v54  ;;  %2350 = vadd.xlane.f32.xlu0 %v2348_v56  ;;  %v2349_v57 = vmul.f32 %v2341_v54, %v2341_v54 }
 0x614   : > { %3433 = vmatprep.subr.bf16.mxu1 %v4022_v4 }
 0x616   : > { %3434 = vmatpush3.bf16.msra.mxu1 %v3761_v39  ;;  %v2659_v39 = vrot.slane %v4611_v34, %v769_v55 }
 0x617   : > { %2352 = vadd.xlane.f32.xlu1 %v2349_v57  ;;  %3435 = vmatprep.subr.bf16.mxu1 %v4022_v4 }
 0x61a   : > { %3436 = vmatpush3.bf16.msra.mxu1 %v3762_v41 }
 0x61b   : > { %3437 = vmatprep.subr.bf16.mxu1 %v4022_v4 }
 0x61e   : > { %3438 = vmatpush3.bf16.msra.mxu1 %v3763_v42 }
 0x61f   : > { %3439 = vmatprep.subr.bf16.mxu1 %v4022_v4 }
 0x622   : > { %3440 = vmatpush3.bf16.msra.mxu1 %v3764_v44 }
 0x698   : > { %v2343_v9 = vpop.xlane.xlu0 %2342 }
 0x699   : > { %v2346_v63 = vmul.f32 0.03125, %v2343_v9 }
 0x69b   : > { %v2356_v13 = vmul.f32 %v2346_v63, %v2346_v63  ;;  %v2362_v52 = vsub.f32 %v2340_v53, %v2346_v63 }
 0x69c   : > { %v2345_v10 = vpop.xlane.xlu1 %2344  ;;  %v2351_v11 = vpop.xlane.xlu0 %2350 }
 0x69d   : > { %v2347_v5 = vmul.f32 0.03125, %v2345_v10  ;;  %v2354_v14 = vmul.f32 0.03125, %v2351_v11 }
 0x69f   : > { %v2358_v16 = vsub.f32 %v2354_v14, %v2356_v13  ;;  %v2357_v19 = vmul.f32 %v2347_v5, %v2347_v5  ;;  %v2363_v17 = vsub.f32 %v2341_v54, %v2347_v5  ;;  %v2530_v13 = vrot.slane %v4611_v34, %v761_v29 }
 0x6a0   : > { %v2353_v18 = vpop.xlane.xlu1 %2352 }
 0x6a1   : > { %v2360_v20 = vmax.f32 %v2358_v16, 0.0  ;;  %v2355_v22 = vmul.f32 0.03125, %v2353_v18 }
 0x6a3   : > { %v2364_v23 = vadd.f32 1e-12, %v2360_v20  ;;  %v2359_v26 = vsub.f32 %v2355_v22, %v2357_v19 }
 0x6a5   : > { %3798 = vrsqrt.f32 %v2364_v23  ;;  %v2361_v43 = vmax.f32 %v2359_v26, 0.0 }
 0x6a7   : > { %v2365_v48 = vadd.f32 1e-12, %v2361_v43 }
 0x6a9   : > { %3800 = vrsqrt.f32 %v2365_v48 }
 0x6b2   : > { %v3799_v27 = vpop.eup %3798 }
 0x6b3   : > { %v2368_v8 = vmul.f32 %v3799_v27, %v2362_v52 }
 0x6b5   : > { %v2374_v32 = vmul.f32 %v2373_v28, %v2368_v8 }
 0x6b6   : > { %v3801_v21 = vpop.eup %3800 }
 0x6b7   : > { %v2369_v31 = vmul.f32 %v3801_v21, %v2363_v17  ;;  %v2380_v24 = vadd.f32 %v2379_v33, %v2374_v32 }
 0x6b9   : > { %v2375_v12 = vmul.f32 %v2373_v28, %v2369_v31 }
 0x6bb   : > { %v4634_v25 = vadd.f32 %v2379_v33, %v2375_v12 }
 0x6bd   : > { %v2382_v36 = vpack.c.bf16 %v4634_v25, %v2380_v24 }
 0x6bf   : > { %3422 = vmatmul.mubr.bf16.vlgmr.msra.gmra.mxu0 %v2382_v36 }
 0x77f   : > { %v2485_v47 = vpop.f32.mrf.mxu0 }
 0x780   : > { %v2486_v45 = vadd.f32 %v2485_v47, %v2402_v46 }
 0x781   : > { %v3423_v49 = vpop.f32.mrf.mxu0 }
 0x782   : > { %v2494_v50 = vmul.f32 0.044715, %v2486_v45  ;;  %v2492_v1 = vmul.f32 0.5, %v2486_v45 }
 0x783   : > { %v2488_v51 = vpop.f32.mrf.mxu0 }
 0x784   : > { %v2496_v53 = vmul.f32 %v2494_v50, %v2486_v45  ;;  %v2489_v35 = vadd.f32 %v2488_v51, %v2402_v46 }
 0x785   : > { %v3424_v15 = vpop.f32.mrf.mxu0 }
 0x786   : > { %v2498_v54 = vmul.f32 %v2496_v53, %v2486_v45  ;;  %v2495_v56 = vmul.f32 0.044715, %v2489_v35  ;;  %v2493_v3 = vmul.f32 0.5, %v2489_v35 }
 0x788   : > { %v2500_v57 = vadd.f32 %v2498_v54, %v2486_v45  ;;  %v2497_v58 = vmul.f32 %v2495_v56, %v2489_v35 }
 0x78a   : > { %v2502_v59 = vmul.f32 0.7978846, %v2500_v57  ;;  %v2499_v60 = vmul.f32 %v2497_v58, %v2489_v35 }
 0x78c   : > { %3802 = vtanh.f32 %v2502_v59  ;;  %v2501_v4 = vadd.f32 %v2499_v60, %v2489_v35 }
 0x78e   : > { %v2503_v61 = vmul.f32 0.7978846, %v2501_v4 }
 0x790   : > { %3804 = vtanh.f32 %v2503_v61 }
 0x799   : > { %v3803_v62 = vpop.eup %3802 }
 0x79a   : > { %v2506_v40 = vadd.f32 1.0, %v3803_v62 }
 0x79c   : > { %v2508_v63 = vmul.f32 %v2506_v40, %v2492_v1 }
 0x79d   : > { %v3805_v0 = vpop.eup %3804 }
 0x79e   : > { %v2507_v9 = vadd.f32 1.0, %v3805_v0 }
 0x7a0   : > { %v2509_v10 = vmul.f32 %v2507_v9, %v2493_v3 }
 0x7a2   : > { %v2510_v11 = vpack.c.bf16 %v2509_v10, %v2508_v63 }
 0x7a4   : > { %3442 = vmatmul.mubr.bf16.vlgmr.msra.gmra.mxu1 %v2510_v11 }
 0x864   : > { %v2613_v5 = vpop.f32.mrf.mxu1 }
 0x865   : > { %v2614_v14 = vadd.f32 %v2613_v5, %v2530_v13 }
 0x866   : > { %v3443_v16 = vpop.f32.mrf.mxu1 }
 0x867   : > { %v2620_v18 = vadd.f32 %v2614_v14, %v2380_v24 }
 0x868   : > { %v2616_v19 = vpop.f32.mrf.mxu1 }
 0x869   : > { %v2617_v20 = vadd.f32 %v2616_v19, %v2530_v13  ;;  %2622 = vadd.xlane.f32.xlu0 %v2620_v18  ;;  %v2628_v26 = vmul.f32 %v2620_v18, %v2620_v18 }
 0x86a   : > { %v3444_v22 = vpop.f32.mrf.mxu1 }
 0x86b   : > { %v2621_v23 = vadd.f32 %v2617_v20, %v4634_v25 }
 0x86d   : > { %2630 = vadd.xlane.f32.xlu0 %v2628_v26  ;;  %2624 = vadd.xlane.f32.xlu1 %v2621_v23  ;;  %v2629_v43 = vmul.f32 %v2621_v23, %v2621_v23 }
 0x871   : > { %2632 = vadd.xlane.f32.xlu1 %v2629_v43 }
 0x8f2   : > { %v2623_v48 = vpop.xlane.xlu0 %2622 }
 0x8f3   : > { %v2626_v52 = vmul.f32 0.03125, %v2623_v48 }
 0x8f5   : > { %v2636_v29 = vmul.f32 %v2626_v52, %v2626_v52  ;;  %v2642_v7 = vsub.f32 %v2620_v18, %v2626_v52 }
 0x8f6   : > { %v2631_v27 = vpop.xlane.xlu0 %2630  ;;  %v2625_v28 = vpop.xlane.xlu1 %2624 }
 0x8f7   : > { %v2634_v8 = vmul.f32 0.03125, %v2631_v27  ;;  %v2627_v17 = vmul.f32 0.03125, %v2625_v28 }
 0x8f9   : > { %v2638_v21 = vsub.f32 %v2634_v8, %v2636_v29  ;;  %v2637_v33 = vmul.f32 %v2627_v17, %v2627_v17  ;;  %v2643_v44 = vsub.f32 %v2621_v23, %v2627_v17 }
 0x8fa   : > { %v2633_v31 = vpop.xlane.xlu1 %2632 }
 0x8fb   : > { %v2640_v32 = vmax.f32 %v2638_v21, 0.0  ;;  %v2635_v12 = vmul.f32 0.03125, %v2633_v31 }
 0x8fd   : > { %v2644_v24 = vadd.f32 1e-12, %v2640_v32  ;;  %v2639_v36 = vsub.f32 %v2635_v12, %v2637_v33 }
 0x8ff   : > { %3806 = vrsqrt.f32 %v2644_v24  ;;  %v2641_v25 = vmax.f32 %v2639_v36, 0.0 }
 0x901   : > { %v2645_v2 = vadd.f32 1e-12, %v2641_v25 }
 0x903   : > { %3808 = vrsqrt.f32 %v2645_v2 }
 0x90c   : > { %v3807_v38 = vpop.eup %3806 }
 0x90d   : > { %v2648_v41 = vmul.f32 %v3807_v38, %v2642_v7 }
 0x90f   : > { %v2654_v42 = vmul.f32 %v2653_v37, %v2648_v41 }
 0x910   : > { %v3809_v46 = vpop.eup %3808 }
 0x911   : > { %v2660_v47 = vadd.f32 %v2659_v39, %v2654_v42  ;;  %v2649_v45 = vmul.f32 %v3809_v46, %v2643_v44 }
 0x913   : > { %v2655_v49 = vmul.f32 %v2653_v37, %v2649_v45 }
 0x915   : > { %v2661_v50 = vadd.f32 %v2659_v39, %v2655_v49  ;;  %2675 = sbr.rel (%p3222_p2) target bundleno = 2778 (0xada), region = 96 }
 0x917   : > { %v3259_v51 = vpack.c.bf16 %v2661_v50, %v2660_v47 }
 0x919   : > { %3260 = vst [vmem:[#allocation2] sm:$0xff] %v3259_v51  }
 0x91a   : > { %v3811_v30 = vld [vmem:[#allocation8 + $0x38] sm:$0xff]   ;;  %v4024_v53 = vmov 0.0   ;;  %v3812_v6 = vld [vmem:[#allocation8 + $0x30] sm:$0xff]   ;;  %vm4025_vm2 = vmmov 0   ;;  %v3813_v55 = vld [vmem:[#allocation8 + $0x28] sm:$0xff]  }
 0x91b   : > { %3445 = vmatprep.subr.bf16.mxu0 %v4024_v53  ;;  %3465 = vmatprep.subr.bf16.mxu1 %v4024_v53  ;;  %v3820_v34 = vld [vmem:[#allocation10 + $0x38] sm:$0xff]   ;;  %v3814_v35 = vld [vmem:[#allocation8 + $0x20] sm:$0xff]   ;;  %v3821_v15 = vld [vmem:[#allocation10 + $0x30] sm:$0xff]  }
 0x91c   : > { %3446 = vmatpush3.bf16.msra.mxu0 %v3811_v30  ;;  %3461 = vmatprep.mubr.msk.bf16.mxu0 %vm4025_vm2, %v4024_v53  ;;  %v3815_v54 = vld [vmem:[#allocation8 + $0x18] sm:$0xff]   ;;  %v3816_v56 = vld [vmem:[#allocation8 + $0x10] sm:$0xff]   ;;  %v3817_v57 = vld [vmem:[#allocation8 + $0x8] sm:$0xff]  }
 0x91d   : > { %3447 = vmatprep.subr.bf16.mxu0 %v4024_v53  ;;  %3481 = vmatprep.mubr.msk.bf16.mxu1 %vm4025_vm2, %v4024_v53  ;;  %v3818_v58 = vld [vmem:[#allocation8] sm:$0xff]   ;;  %v3822_v60 = vld [vmem:[#allocation10 + $0x28] sm:$0xff]   ;;  %v3824_v61 = vld [vmem:[#allocation10 + $0x18] sm:$0xff]  }
 0x91e   : > { %3466 = vmatpush3.bf16.msra.mxu1 %v3820_v34  ;;  %v3823_v4 = vld [vmem:[#allocation10 + $0x20] sm:$0xff]   ;;  %v3825_v62 = vld [vmem:[#allocation10 + $0x10] sm:$0xff]   ;;  %v3826_v40 = vld [vmem:[#allocation10 + $0x8] sm:$0xff]  }
 0x91f   : > { %3467 = vmatprep.subr.bf16.mxu1 %v4024_v53  ;;  %v3827_v0 = vld [vmem:[#allocation10] sm:$0xff]   ;;  %v3223_v1 = vld [vmem:[%s4747_s14] ss:$0 sm:$0xff]  ;;  %v3233_v18 = vld [vmem:[%s4747_s14 + $0x1] ss:$0 sm:$0xff] }
 0x920   : > { %3448 = vmatpush3.bf16.msra.mxu0 %v3812_v6  ;;  %v3819_v59 = vld [vmem:[#allocation2] sm:$0xff]  }
 0x921   : > { %3449 = vmatprep.subr.bf16.mxu0 %v4024_v53 }
 0x922   : > { %3468 = vmatpush3.bf16.msra.mxu1 %v3821_v15 }
 0x923   : > { %3469 = vmatprep.subr.bf16.mxu1 %v4024_v53 }
 0x924   : > { %3450 = vmatpush3.bf16.msra.mxu0 %v3813_v55 }
 0x925   : > { %3451 = vmatprep.subr.bf16.mxu0 %v4024_v53 }
 0x926   : > { %3470 = vmatpush3.bf16.msra.mxu1 %v3822_v60 }
 0x927   : > { %3471 = vmatprep.subr.bf16.mxu1 %v4024_v53 }
 0x928   : > { %3452 = vmatpush3.bf16.msra.mxu0 %v3814_v35 }
 0x929   : > { %3453 = vmatprep.subr.bf16.mxu0 %v4024_v53 }
 0x92a   : > { %3472 = vmatpush3.bf16.msra.mxu1 %v3823_v4 }
 0x92b   : > { %3473 = vmatprep.subr.bf16.mxu1 %v4024_v53 }
 0x92c   : > { %3454 = vmatpush3.bf16.msra.mxu0 %v3815_v54 }
 0x92d   : > { %3455 = vmatprep.subr.bf16.mxu0 %v4024_v53 }
 0x92e   : > { %3474 = vmatpush3.bf16.msra.mxu1 %v3824_v61 }
 0x92f   : > { %3475 = vmatprep.subr.bf16.mxu1 %v4024_v53 }
 0x930   : > { %3456 = vmatpush3.bf16.msra.mxu0 %v3816_v56 }
 0x931   : > { %3457 = vmatprep.subr.bf16.mxu0 %v4024_v53 }
 0x932   : > { %3476 = vmatpush3.bf16.msra.mxu1 %v3825_v62 }
 0x933   : > { %3477 = vmatprep.subr.bf16.mxu1 %v4024_v53 }
 0x934   : > { %3458 = vmatpush3.bf16.msra.mxu0 %v3817_v57 }
 0x935   : > { %3459 = vmatprep.subr.bf16.mxu0 %v4024_v53 }
 0x936   : > { %3478 = vmatpush3.bf16.msra.mxu1 %v3826_v40 }
 0x937   : > { %3479 = vmatprep.subr.bf16.mxu1 %v4024_v53 }
 0x938   : > { %3460 = vmatpush3.bf16.msra.mxu0 %v3818_v58 }
 0x93a   : > { %3480 = vmatpush3.bf16.msra.mxu1 %v3827_v0 }
 0x93b   : > { %3462 = vmatmul.mubr.bf16.vlgmr.msra.gmra.mxu0 %v3819_v59 }
 0x9fb   : > { %v2787_v3 = vpop.f32.mrf.mxu0 }
 0x9fc   : > { %v2788_v9 = vadd.f32 %v3223_v1, %v2787_v3 }
 0x9fd   : > { %v3463_v63 = vpop.f32.mrf.mxu0 }
 0x9fe   : > { %3828 = vtanh.f32 %v2788_v9 }
 0x9ff   : > { %v2790_v10 = vpop.f32.mrf.mxu0 }
 0xa00   : > { %v2791_v11 = vadd.f32 %v3223_v1, %v2790_v10 }
 0xa01   : > { %v3464_v13 = vpop.f32.mrf.mxu0 }
 0xa02   : > { %3830 = vtanh.f32 %v2791_v11 }
 0xa0b   : > { %v3829_v5 = vpop.eup %3828 }
 0xa0f   : > { %v3831_v14 = vpop.eup %3830 }
 0xa10   : > { %v2796_v16 = vpack.c.bf16 %v3831_v14, %v3829_v5 }
 0xa12   : > { %3482 = vmatmul.mubr.bf16.vlgmr.msra.gmra.mxu1 %v2796_v16 }
 0xad2   : > { %v2900_v19 = vpop.f32.mrf.mxu1 }
 0xad3   : > { %v2901_v20 = vadd.f32 %v3233_v18, %v2900_v19 }
 0xad4   : > { %v3483_v22 = vpop.f32.mrf.mxu1 }
 0xad5   : > { %2907 = vst [vmem:[%s4748_s26] sm:$0xff] %v2901_v20 }
 0xad6   : > { %v2903_v23 = vpop.f32.mrf.mxu1 }
 0xad7   : > { %v2904_v26 = vadd.f32 %v3233_v18, %v2903_v23 }
 0xad8   : > { %v3484_v43 = vpop.f32.mrf.mxu1 }
 0xad9   : > { %2908 = vst [vmem:[%s4748_s26 + $0x8] sm:$0xff] %v2904_v26 }
 0xada PF: > { %s4749_s24 = sld [smem:[#allocation15_spill]]  ;;  %s4752_s21 = smov %s4002_s22 }
 0xadb   : > { %s4750_s1 = sld [smem:[#allocation14_spill]] }
 0xadc   : > { %s4751_s23 = sld [smem:[#allocation16_spill]] }
 0xae0   : > { %p26_p3 = scmp.ge.s32.totalorder %s4749_s24, 4  }
 0xae1   : > { %s4753_s22 = smov %s4750_s1 }
 0xae2   :  { %28 = sbr.rel (!%p26_p3) target bundleno = 13 (0xd), region = 153 }
 0xae7   :  { %2920 = vsyncpa [#allocation4], 1 }
 0xae8   :  { %2922 = vsyncpa [#allocation4 + $0x1], 1 }
 0xae9   :  { %2923 = vsyncpa [#allocation6], 1 }
 0xaea   :  { %2925 = vsyncpa [#allocation6 + $0x1], 1 }
 0xaeb   :  { %2926 = vsyncpa [#allocation9], 1 }

</bundles_post_ra>
